<compile_context>
chip_gen: v6e
topology: v6e:2x2x1
jax: 0.10.0
libtpu: 0.0.40
codegen_flags: <defaults>
</compile_context>

<pallas_src>
import functools

import jax
import jax.numpy as jnp
from jax.experimental import pallas as pl
from jax.experimental.pallas import tpu as pltpu

# MXU inputs are cast to bf16 (f32 accumulation).  Set to jnp.float32 for
# bit-closer-to-PyTorch numerics at the cost of MXU throughput / HBM traffic.
_MXU_DTYPE = jnp.bfloat16
_VMEM_LIMIT = 32 * 1024 * 1024  # safe on v5e/v6e/v7x


def _pick_tile(size, preferred, align):
    """Largest tile <= preferred that divides `size` and is a multiple of `align`;
    falls back to the full dimension (a full-extent block is always legal)."""
    if size <= preferred:
        return size
    t = (preferred // align) * align
    while t >= align:
        if size % t == 0:
            return t
        t -= align
    return size


# ----------------------------------------------------------------------------
# Tiled linear: y = x @ w + b  (used for the patch embedding)
# ----------------------------------------------------------------------------
def _matmul_bias_kernel(x_ref, w_ref, b_ref, o_ref, acc_ref):
    @pl.when(pl.program_id(2) == 0)
    def _():
        acc_ref[...] = jnp.zeros_like(acc_ref)

    acc_ref[...] += jnp.dot(
        x_ref[...].astype(_MXU_DTYPE),
        w_ref[...].astype(_MXU_DTYPE),
        preferred_element_type=jnp.float32,
    )

    @pl.when(pl.program_id(2) == pl.num_programs(2) - 1)
    def _():
        o_ref[...] = (acc_ref[...] + b_ref[...]).astype(o_ref.dtype)


def pallas_linear(x2d, w, b, *, tm=256, tn=256, tk=512):
    """x2d: (M, K) f32, w: (K, N) (bf16 ok), b: (N,) f32 -> (M, N) f32."""
    M, K = x2d.shape
    N = w.shape[1]
    tm = _pick_tile(M, tm, 8)
    tn = _pick_tile(N, tn, 128)
    tk = _pick_tile(K, tk, 128)
    return pl.pallas_call(
        _matmul_bias_kernel,
        out_shape=jax.ShapeDtypeStruct((M, N), jnp.float32),
        grid=(M // tm, N // tn, K // tk),
        in_specs=[
            pl.BlockSpec((tm, tk), lambda i, j, k: (i, k)),
            pl.BlockSpec((tk, tn), lambda i, j, k: (k, j)),
            pl.BlockSpec((1, tn), lambda i, j, k: (0, j)),
        ],
        out_specs=pl.BlockSpec((tm, tn), lambda i, j, k: (i, j)),
        scratch_shapes=[pltpu.VMEM((tm, tn), jnp.float32)],
        compiler_params=pltpu.CompilerParams(
            dimension_semantics=("parallel", "parallel", "arbitrary"),
            vmem_limit_bytes=_VMEM_LIMIT,
        ),
    )(x2d, w, b.reshape(1, N))


# ----------------------------------------------------------------------------
# Fused transformer-encoder layer (post-norm, ReLU):
#   x <- LN1(x + out_proj(MHA(x)));  x <- LN2(x + W2 relu(W1 x + b1) + b2)
# Attention is over the L (= batch, batch_first=False quirk) axis.  One grid
# step processes a tile of the sequence axis N; everything stays in VMEM.
# ----------------------------------------------------------------------------
def _encoder_layer_kernel(x_ref, win_ref, bin_ref, wout_ref, bout_ref,
                          g1_ref, be1_ref, w1_ref, b1f_ref, w2_ref, b2f_ref,
                          g2_ref, be2_ref, o_ref, *, L, heads, scale, eps):
    E = x_ref.shape[2]
    hd = E // heads

    win = win_ref[...].astype(_MXU_DTYPE)      # (E, 3E)  cols: [Q | K | V]
    wout = wout_ref[...].astype(_MXU_DTYPE)    # (E, E)
    w1 = w1_ref[...].astype(_MXU_DTYPE)        # (E, F)
    w2 = w2_ref[...].astype(_MXU_DTYPE)        # (F, E)
    b_in = bin_ref[...]                        # (1, 3E)

    # --- QKV projection per batch slice (L = image batch, small) ---
    xs, qkvs = [], []
    for l in range(L):
        x_l = x_ref[l]                                           # (nb, E) f32
        xs.append(x_l)
        qkvs.append(
            jnp.dot(x_l.astype(_MXU_DTYPE), win,
                    preferred_element_type=jnp.float32) + b_in)  # (nb, 3E)

    # --- multi-head attention over L, then out-proj + residual + LN1 + MLP + LN2 ---
    # NOTE: loops over L and heads are statically unrolled; L is the image batch
    # (tiny), so attention is done with VPU mul + lane-reductions per (l, m) pair.
    for l in range(L):
        head_outs = []
        for h in range(heads):
            q = qkvs[l][:, h * hd:(h + 1) * hd] * scale          # (nb, hd)
            # scores against every key slice m (each (nb, 1))
            s = [jnp.sum(q * qkvs[m][:, E + h * hd:E + (h + 1) * hd],
                         axis=-1, keepdims=True) for m in range(L)]
            smax = s[0]
            for m in range(1, L):
                smax = jnp.maximum(smax, s[m])
            p = [jnp.exp(s[m] - smax) for m in range(L)]
            tot = p[0]
            for m in range(1, L):
                tot = tot + p[m]
            inv = pl.reciprocal(tot, approx=True)
            oh = (p[0] * inv) * qkvs[0][:, 2 * E + h * hd:2 * E + (h + 1) * hd]
            for m in range(1, L):
                oh = oh + (p[m] * inv) * qkvs[m][:, 2 * E + h * hd:2 * E + (h + 1) * hd]
            head_outs.append(oh)                                  # (nb, hd)
        attn_l = jnp.concatenate(head_outs, axis=-1)              # (nb, E)

        # out-proj + residual + LayerNorm1
        y = jnp.dot(attn_l.astype(_MXU_DTYPE), wout,
                    preferred_element_type=jnp.float32) + bout_ref[...] + xs[l]
        mu = jnp.mean(y, axis=-1, keepdims=True)
        d = y - mu
        var = jnp.mean(d * d, axis=-1, keepdims=True)
        x1 = d * jax.lax.rsqrt(var + eps) * g1_ref[...] + be1_ref[...]

        # MLP + residual + LayerNorm2 (hidden (nb, F) never leaves VMEM)
        hmid = jnp.maximum(
            jnp.dot(x1.astype(_MXU_DTYPE), w1,
                    preferred_element_type=jnp.float32) + b1f_ref[...], 0.0)
        y2 = jnp.dot(hmid.astype(_MXU_DTYPE), w2,
                     preferred_element_type=jnp.float32) + b2f_ref[...] + x1
        mu2 = jnp.mean(y2, axis=-1, keepdims=True)
        d2 = y2 - mu2
        var2 = jnp.mean(d2 * d2, axis=-1, keepdims=True)
        o_ref[l] = (d2 * jax.lax.rsqrt(var2 + eps) * g2_ref[...] + be2_ref[...]
                    ).astype(o_ref.dtype)


def pallas_encoder_layer(x, lp, *, heads, eps=1e-5, n_tile=256):
    """x: (L, N, E) f32; lp: layer params (pre-transposed, bf16 weights)."""
    L, N, E = x.shape
    F = lp["lin1_w"].shape[1]
    nb = _pick_tile(N, n_tile, 8)
    scale = 1.0 / float(E // heads) ** 0.5
    return pl.pallas_call(
        functools.partial(_encoder_layer_kernel, L=L, heads=heads,
                          scale=scale, eps=eps),
        out_shape=jax.ShapeDtypeStruct((L, N, E), jnp.float32),
        grid=(N // nb,),
        in_specs=[
            pl.BlockSpec((L, nb, E), lambda i: (0, i, 0)),      # x
            pl.BlockSpec((E, 3 * E), lambda i: (0, 0)),          # in_proj_w
            pl.BlockSpec((1, 3 * E), lambda i: (0, 0)),          # in_proj_b
            pl.BlockSpec((E, E), lambda i: (0, 0)),              # out_proj_w
            pl.BlockSpec((1, E), lambda i: (0, 0)),              # out_proj_b
            pl.BlockSpec((1, E), lambda i: (0, 0)),              # ln1_g
            pl.BlockSpec((1, E), lambda i: (0, 0)),              # ln1_b
            pl.BlockSpec((E, F), lambda i: (0, 0)),              # lin1_w
            pl.BlockSpec((1, F), lambda i: (0, 0)),              # lin1_b
            pl.BlockSpec((F, E), lambda i: (0, 0)),              # lin2_w
            pl.BlockSpec((1, E), lambda i: (0, 0)),              # lin2_b
            pl.BlockSpec((1, E), lambda i: (0, 0)),              # ln2_g
            pl.BlockSpec((1, E), lambda i: (0, 0)),              # ln2_b
        ],
        out_specs=pl.BlockSpec((L, nb, E), lambda i: (0, i, 0)),
        compiler_params=pltpu.CompilerParams(
            dimension_semantics=("parallel",),
            vmem_limit_bytes=_VMEM_LIMIT,
        ),
    )(x,
      lp["in_proj_w"], lp["in_proj_b"].reshape(1, 3 * E),
      lp["out_proj_w"], lp["out_proj_b"].reshape(1, E),
      lp["ln1_g"].reshape(1, E), lp["ln1_b"].reshape(1, E),
      lp["lin1_w"], lp["lin1_b"].reshape(1, F),
      lp["lin2_w"], lp["lin2_b"].reshape(1, E),
      lp["ln2_g"].reshape(1, E), lp["ln2_b"].reshape(1, E))


# ----------------------------------------------------------------------------
# Fused head: mean over tokens + classifier + softmax(dim=1)
# ----------------------------------------------------------------------------
def _head_kernel(x_ref, w_ref, b_ref, o_ref):
    x = x_ref[...]                                      # (B, S, D)
    pooled = jnp.mean(x, axis=1)                        # mean over dim=1
    logits = jnp.dot(pooled, w_ref[...], preferred_element_type=jnp.float32)
    logits = logits + b_ref[...]
    logits = logits - jnp.max(logits, axis=-1, keepdims=True)
    e = jnp.exp(logits)
    o_ref[...] = (e / jnp.sum(e, axis=-1, keepdims=True)).astype(o_ref.dtype)


def pallas_pool_classify_softmax(x, w, b):
    B, S, D = x.shape
    C = w.shape[1]
    return pl.pallas_call(
        _head_kernel,
        out_shape=jax.ShapeDtypeStruct((B, C), jnp.float32),
        grid=(1,),
        in_specs=[
            pl.BlockSpec((B, S, D), lambda i: (0, 0, 0)),
            pl.BlockSpec((D, C), lambda i: (0, 0)),
            pl.BlockSpec((1, C), lambda i: (0, 0)),
        ],
        out_specs=pl.BlockSpec((B, C), lambda i: (0, 0)),
        compiler_params=pltpu.CompilerParams(
            dimension_semantics=("arbitrary",),
            vmem_limit_bytes=_VMEM_LIMIT,
        ),
    )(x, w, b.reshape(1, C))


# ----------------------------------------------------------------------------
# Model wrapper (only layout plumbing lives outside the Pallas kernels)
# ----------------------------------------------------------------------------
def vit_forward(x_nchw, params, *, patch_size, heads):
    B, C, H, W = x_nchw.shape
    p = patch_size
    Hp, Wp = H // p, W // p
    num_patches = Hp * Wp

    # Patch embedding: Conv2d(k=stride=p) == per-patch linear over (c, u, v).
    patches = x_nchw.reshape(B, C, Hp, p, Wp, p).transpose(0, 2, 4, 1, 3, 5)
    patches = patches.reshape(B * num_patches, C * p * p)
    tokens = pallas_linear(patches, params["patch_w"], params["patch_b"])
    dim = tokens.shape[-1]
    tokens = tokens.reshape(B, num_patches, dim)

    # Concatenate positional embedding as extra tokens (torch.cat along dim=-2).
    pos = jnp.broadcast_to(params["pos_emb"], (B,) + params["pos_emb"].shape[1:])
    x = jnp.concatenate([tokens, pos], axis=1)          # (B, S, dim), S = 2*np + 1

    # TransformerEncoder, PyTorch default (L, N, E) = (B, S, dim) layout.
    # One fused Pallas kernel per encoder layer.
    for lp in params["layers"]:
        x = pallas_encoder_layer(x, lp, heads=heads)

    # mean over dim=1 + classifier + softmax(dim=1), fused.
    return pallas_pool_classify_softmax(x, params["cls_w"], params["cls_b"])


# ----------------------------------------------------------------------------
# Deterministic parameter init (shapes follow the module's __init__).
# Weights are stored pre-transposed to (K, N) and pre-cast to the MXU dtype so
# the forward path never transposes / casts them.
# ----------------------------------------------------------------------------
def init_params(key, *, img_size, patch_size, num_classes, dim, depth, heads, mlp_dim):
    del heads  # head count only affects reshapes, not parameter shapes
    num_patches = (img_size // patch_size) ** 2
    keys = jax.random.split(key, 4 + depth)

    def nrm(k, shape, scale=0.02):
        return (scale * jax.random.normal(k, shape)).astype(jnp.float32)

    def mxu(w):
        return w.astype(_MXU_DTYPE)

    patch_w = nrm(keys[0], (dim, 3, patch_size, patch_size))   # PyTorch conv layout
    params = {
        "patch_w": mxu(patch_w.reshape(dim, -1).T),            # (3*p*p, dim)
        "patch_b": nrm(keys[1], (dim,)),
        "pos_emb": nrm(keys[2], (1, num_patches + 1, dim), scale=1.0),
        "cls_w": nrm(keys[3], (num_classes, dim)).T,           # (dim, C), f32
        "cls_b": jnp.zeros((num_classes,), jnp.float32),
        "layers": [],
    }
    for d in range(depth):
        lk = jax.random.split(keys[4 + d], 8)
        params["layers"].append({
            "in_proj_w": mxu(nrm(lk[0], (3 * dim, dim)).T),    # (dim, 3*dim) [Q|K|V]
            "in_proj_b": nrm(lk[1], (3 * dim,)),
            "out_proj_w": mxu(nrm(lk[2], (dim, dim)).T),       # (dim, dim)
            "out_proj_b": nrm(lk[3], (dim,)),
            "lin1_w": mxu(nrm(lk[4], (mlp_dim, dim)).T),       # (dim, mlp_dim)
            "lin1_b": nrm(lk[5], (mlp_dim,)),
            "lin2_w": mxu(nrm(lk[6], (dim, mlp_dim)).T),       # (mlp_dim, dim)
            "lin2_b": nrm(lk[7], (dim,)),
            "ln1_g": jnp.ones((dim,), jnp.float32),
            "ln1_b": jnp.zeros((dim,), jnp.float32),
            "ln2_g": jnp.ones((dim,), jnp.float32),
            "ln2_b": jnp.zeros((dim,), jnp.float32),
        })
    return params


if __name__ == "__main__":
    # Small, consistent configuration: img 16, patch 8 -> 4 patches, dim 32,
    # depth 2, heads 4, mlp 64, 4 classes, batch 2.
    IMG, PATCH, NUM_CLASSES, DIM, DEPTH, HEADS, MLP, B = 16, 8, 4, 32, 2, 4, 64, 2

    key = jax.random.PRNGKey(0)
    kx, kp = jax.random.split(key)
    x = jax.random.normal(kx, (B, 3, IMG, IMG), dtype=jnp.float32)
    params = init_params(kp, img_size=IMG, patch_size=PATCH, num_classes=NUM_CLASSES,
                         dim=DIM, depth=DEPTH, heads=HEADS, mlp_dim=MLP)

    fwd = jax.jit(functools.partial(vit_forward, patch_size=PATCH, heads=HEADS))
    out = jax.block_until_ready(fwd(x, params))

    assert out.shape == (B, NUM_CLASSES), out.shape
    assert bool(jnp.all(jnp.isfinite(out)))
    # rows sum to 1 (softmax over classes)
    assert bool(jnp.allclose(jnp.sum(out, axis=1), 1.0, atol=1e-4))
    print("KERNEL_OK")
</pallas_src>

<mosaic_0001>
module attributes {stable_mosaic.version = 11 : i64} {
  func.func @_matmul_bias_kernel(%arg0: i32, %arg1: i32, %arg2: i32, %arg3: memref<8x192xf32, #tpu.memory_space<vmem>>, %arg4: memref<192x32xbf16, #tpu.memory_space<vmem>>, %arg5: memref<1x32xf32, #tpu.memory_space<vmem>>, %arg6: memref<8x32xf32, #tpu.memory_space<vmem>>, %arg7: memref<8x32xf32, #tpu.memory_space<vmem>>) attributes {dimension_semantics = [#tpu.dimension_semantics<parallel>, #tpu.dimension_semantics<parallel>, #tpu.dimension_semantics<arbitrary>], iteration_bounds = array<i64: 1, 1, 1>, scalar_prefetch = 0 : i64, scratch_operands = 1 : i64, tpu.core_type = #tpu.core_type<tc>, window_params = [{transform_indices = @transform_0, window_bounds = array<i64: 8, 192>}, {transform_indices = @transform_1, window_bounds = array<i64: 192, 32>}, {transform_indices = @transform_2, window_bounds = array<i64: 1, 32>}, {transform_indices = @transform_3, window_bounds = array<i64: 8, 32>}]} {
    %c0_i32 = arith.constant 0 : i32
    %0 = arith.cmpi eq, %arg2, %c0_i32 : i32
    %1 = arith.extui %0 : i1 to i32
    %c0_i32_0 = arith.constant 0 : i32
    %2 = arith.cmpi ne, %1, %c0_i32_0 : i32
    scf.if %2 {
      %cst_10 = arith.constant 0.000000e+00 : f32
      %13 = vector.broadcast %cst_10 : f32 to vector<8x32xf32>
      %c0_11 = arith.constant 0 : index
      %c0_12 = arith.constant 0 : index
      %14 = vector.load %arg7[%c0_11, %c0_12] : memref<8x32xf32, #tpu.memory_space<vmem>>, vector<8x32xf32>
      tpu.vector_store %arg7[%c0_11, %c0_12], %13 {strides = array<i32>} : memref<8x32xf32, #tpu.memory_space<vmem>>, vector<8x32xf32>,
    } else {
    }
    %c0 = arith.constant 0 : index
    %c0_1 = arith.constant 0 : index
    %3 = vector.load %arg7[%c0, %c0_1] : memref<8x32xf32, #tpu.memory_space<vmem>>, vector<8x32xf32>
    %c0_2 = arith.constant 0 : index
    %c0_3 = arith.constant 0 : index
    %4 = vector.load %arg3[%c0_2, %c0_3] : memref<8x192xf32, #tpu.memory_space<vmem>>, vector<8x192xf32>
    %5 = arith.truncf %4 : vector<8x192xf32> to vector<8x192xbf16>
    %c0_4 = arith.constant 0 : index
    %c0_5 = arith.constant 0 : index
    %6 = vector.load %arg4[%c0_4, %c0_5] : memref<192x32xbf16, #tpu.memory_space<vmem>>, vector<192x32xbf16>
    %cst = arith.constant dense<0.000000e+00> : vector<8x32xf32>
    %7 = tpu.matmul %5, %6, %cst {dimension_numbers = #tpu.dot_dimension_numbers<[1], [0], [0], [1], [0, 0, 1, 1], [], []>} : vector<8x192xbf16>, vector<192x32xbf16>, vector<8x32xf32> -> vector<8x32xf32>
    %8 = arith.addf %3, %7 : vector<8x32xf32>
    %c0_6 = arith.constant 0 : index
    %c0_7 = arith.constant 0 : index
    %9 = vector.load %arg7[%c0_6, %c0_7] : memref<8x32xf32, #tpu.memory_space<vmem>>, vector<8x32xf32>
    tpu.vector_store %arg7[%c0_6, %c0_7], %8 {strides = array<i32>} : memref<8x32xf32, #tpu.memory_space<vmem>>, vector<8x32xf32>,
    %c0_i32_8 = arith.constant 0 : i32
    %10 = arith.cmpi eq, %arg2, %c0_i32_8 : i32
    %11 = arith.extui %10 : i1 to i32
    %c0_i32_9 = arith.constant 0 : i32
    %12 = arith.cmpi ne, %11, %c0_i32_9 : i32
    scf.if %12 {
      %c0_10 = arith.constant 0 : index
      %c0_11 = arith.constant 0 : index
      %13 = vector.load %arg7[%c0_10, %c0_11] : memref<8x32xf32, #tpu.memory_space<vmem>>, vector<8x32xf32>
      %c0_12 = arith.constant 0 : index
      %c0_13 = arith.constant 0 : index
      %14 = vector.load %arg5[%c0_12, %c0_13] : memref<1x32xf32, #tpu.memory_space<vmem>>, vector<1x32xf32>
      %15 = vector.broadcast %14 : vector<1x32xf32> to vector<8x32xf32>
      %16 = arith.addf %13, %15 : vector<8x32xf32>
      %c0_14 = arith.constant 0 : index
      %c0_15 = arith.constant 0 : index
      %17 = vector.load %arg6[%c0_14, %c0_15] : memref<8x32xf32, #tpu.memory_space<vmem>>, vector<8x32xf32>
      tpu.vector_store %arg6[%c0_14, %c0_15], %16 {strides = array<i32>} : memref<8x32xf32, #tpu.memory_space<vmem>>, vector<8x32xf32>,
    } else {
    }
    return
  }
  func.func @transform_0(%arg0: i32, %arg1: i32, %arg2: i32) -> (i32, i32) {
    %c0_i32 = arith.constant 0 : i32
    return %arg0, %arg2 : i32, i32
  }
  func.func @transform_1(%arg0: i32, %arg1: i32, %arg2: i32) -> (i32, i32) {
    %c0_i32 = arith.constant 0 : i32
    return %arg2, %arg1 : i32, i32
  }
  func.func @transform_2(%arg0: i32, %arg1: i32, %arg2: i32) -> (i32, i32) {
    %c0_i32 = arith.constant 0 : i32
    %c0_i32_0 = arith.constant 0 : i32
    return %c0_i32, %arg1 : i32, i32
  }
  func.func @transform_3(%arg0: i32, %arg1: i32, %arg2: i32) -> (i32, i32) {
    %c0_i32 = arith.constant 0 : i32
    return %arg0, %arg1 : i32, i32
  }
}

module attributes {stable_mosaic.version = 11 : i64} {
  func.func @_head_kernel(%arg0: i32, %arg1: memref<2x9x32xf32, #tpu.memory_space<vmem>>, %arg2: memref<32x4xf32, #tpu.memory_space<vmem>>, %arg3: memref<1x4xf32, #tpu.memory_space<vmem>>, %arg4: memref<2x4xf32, #tpu.memory_space<vmem>>) attributes {dimension_semantics = [#tpu.dimension_semantics<arbitrary>], iteration_bounds = array<i64: 1>, scalar_prefetch = 0 : i64, scratch_operands = 0 : i64, tpu.core_type = #tpu.core_type<tc>, window_params = [{pipeline_mode = #tpu.pipeline_mode<synchronous>, transform_indices = @transform_0, window_bounds = array<i64: 2, 9, 32>}, {pipeline_mode = #tpu.pipeline_mode<synchronous>, transform_indices = @transform_1, window_bounds = array<i64: 32, 4>}, {pipeline_mode = #tpu.pipeline_mode<synchronous>, transform_indices = @transform_2, window_bounds = array<i64: 1, 4>}, {pipeline_mode = #tpu.pipeline_mode<synchronous>, transform_indices = @transform_3, window_bounds = array<i64: 2, 4>}]} {
    %c0 = arith.constant 0 : index
    %c0_0 = arith.constant 0 : index
    %c0_1 = arith.constant 0 : index
    %0 = vector.load %arg1[%c0, %c0_0, %c0_1] : memref<2x9x32xf32, #tpu.memory_space<vmem>>, vector<2x9x32xf32>
    %cst = arith.constant dense<0.000000e+00> : vector<2x32xf32>
    %1 = vector.multi_reduction <add>, %0, %cst [1] : vector<2x9x32xf32> to vector<2x32xf32>
    %cst_2 = arith.constant 9.000000e+00 : f32
    %2 = vector.broadcast %cst_2 : f32 to vector<2x32xf32>
    %3 = arith.divf %1, %2 : vector<2x32xf32>
    %c0_3 = arith.constant 0 : index
    %c0_4 = arith.constant 0 : index
    %4 = vector.load %arg2[%c0_3, %c0_4] : memref<32x4xf32, #tpu.memory_space<vmem>>, vector<32x4xf32>
    %cst_5 = arith.constant dense<0.000000e+00> : vector<2x4xf32>
    %5 = tpu.matmul %3, %4, %cst_5 {dimension_numbers = #tpu.dot_dimension_numbers<[1], [0], [0], [1], [0, 0, 1, 1], [], []>} : vector<2x32xf32>, vector<32x4xf32>, vector<2x4xf32> -> vector<2x4xf32>
    %c0_6 = arith.constant 0 : index
    %c0_7 = arith.constant 0 : index
    %6 = vector.load %arg3[%c0_6, %c0_7] : memref<1x4xf32, #tpu.memory_space<vmem>>, vector<1x4xf32>
    %7 = vector.broadcast %6 : vector<1x4xf32> to vector<2x4xf32>
    %8 = arith.addf %5, %7 : vector<2x4xf32>
    %cst_8 = arith.constant dense<0xFF800000> : vector<2xf32>
    %9 = vector.multi_reduction <maximumf>, %8, %cst_8 [1] : vector<2x4xf32> to vector<2xf32>
    %10 = vector.shape_cast %9 : vector<2xf32> to vector<2x1xf32>
    %11 = vector.broadcast %10 : vector<2x1xf32> to vector<2x4xf32>
    %12 = arith.subf %8, %11 : vector<2x4xf32>
    %13 = math.exp %12 : vector<2x4xf32>
    %cst_9 = arith.constant dense<0.000000e+00> : vector<2xf32>
    %14 = vector.multi_reduction <add>, %13, %cst_9 [1] : vector<2x4xf32> to vector<2xf32>
    %15 = vector.shape_cast %14 : vector<2xf32> to vector<2x1xf32>
    %16 = vector.broadcast %15 : vector<2x1xf32> to vector<2x4xf32>
    %17 = arith.divf %13, %16 : vector<2x4xf32>
    %c0_10 = arith.constant 0 : index
    %c0_11 = arith.constant 0 : index
    %18 = vector.load %arg4[%c0_10, %c0_11] : memref<2x4xf32, #tpu.memory_space<vmem>>, vector<2x4xf32>
    tpu.vector_store %arg4[%c0_10, %c0_11], %17 {strides = array<i32>} : memref<2x4xf32, #tpu.memory_space<vmem>>, vector<2x4xf32>,
    return
  }
  func.func @transform_0(%arg0: i32) -> (i32, i32, i32) {
    %c0_i32 = arith.constant 0 : i32
    %c0_i32_0 = arith.constant 0 : i32
    %c0_i32_1 = arith.constant 0 : i32
    %c0_i32_2 = arith.constant 0 : i32
    return %c0_i32, %c0_i32_0, %c0_i32_1 : i32, i32, i32
  }
  func.func @transform_1(%arg0: i32) -> (i32, i32) {
    %c0_i32 = arith.constant 0 : i32
    %c0_i32_0 = arith.constant 0 : i32
    %c0_i32_1 = arith.constant 0 : i32
    return %c0_i32, %c0_i32_0 : i32, i32
  }
  func.func @transform_2(%arg0: i32) -> (i32, i32) {
    %c0_i32 = arith.constant 0 : i32
    %c0_i32_0 = arith.constant 0 : i32
    %c0_i32_1 = arith.constant 0 : i32
    return %c0_i32, %c0_i32_0 : i32, i32
  }
  func.func @transform_3(%arg0: i32) -> (i32, i32) {
    %c0_i32 = arith.constant 0 : i32
    %c0_i32_0 = arith.constant 0 : i32
    %c0_i32_1 = arith.constant 0 : i32
    return %c0_i32, %c0_i32_0 : i32, i32
  }
}

module attributes {stable_mosaic.version = 11 : i64} {
  func.func @_encoder_layer_kernel(%arg0: i32, %arg1: memref<2x9x32xf32, #tpu.memory_space<vmem>>, %arg2: memref<32x96xbf16, #tpu.memory_space<vmem>>, %arg3: memref<1x96xf32, #tpu.memory_space<vmem>>, %arg4: memref<32x32xbf16, #tpu.memory_space<vmem>>, %arg5: memref<1x32xf32, #tpu.memory_space<vmem>>, %arg6: memref<1x32xf32, #tpu.memory_space<vmem>>, %arg7: memref<1x32xf32, #tpu.memory_space<vmem>>, %arg8: memref<32x64xbf16, #tpu.memory_space<vmem>>, %arg9: memref<1x64xf32, #tpu.memory_space<vmem>>, %arg10: memref<64x32xbf16, #tpu.memory_space<vmem>>, %arg11: memref<1x32xf32, #tpu.memory_space<vmem>>, %arg12: memref<1x32xf32, #tpu.memory_space<vmem>>, %arg13: memref<1x32xf32, #tpu.memory_space<vmem>>, %arg14: memref<2x9x32xf32, #tpu.memory_space<vmem>>) attributes {dimension_semantics = [#tpu.dimension_semantics<parallel>], iteration_bounds = array<i64: 1>, scalar_prefetch = 0 : i64, scratch_operands = 0 : i64, tpu.core_type = #tpu.core_type<tc>, window_params = [{transform_indices = @transform_0, window_bounds = array<i64: 2, 9, 32>}, {pipeline_mode = #tpu.pipeline_mode<synchronous>, transform_indices = @transform_1, window_bounds = array<i64: 32, 96>}, {pipeline_mode = #tpu.pipeline_mode<synchronous>, transform_indices = @transform_2, window_bounds = array<i64: 1, 96>}, {pipeline_mode = #tpu.pipeline_mode<synchronous>, transform_indices = @transform_3, window_bounds = array<i64: 32, 32>}, {pipeline_mode = #tpu.pipeline_mode<synchronous>, transform_indices = @transform_4, window_bounds = array<i64: 1, 32>}, {pipeline_mode = #tpu.pipeline_mode<synchronous>, transform_indices = @transform_5, window_bounds = array<i64: 1, 32>}, {pipeline_mode = #tpu.pipeline_mode<synchronous>, transform_indices = @transform_6, window_bounds = array<i64: 1, 32>}, {pipeline_mode = #tpu.pipeline_mode<synchronous>, transform_indices = @transform_7, window_bounds = array<i64: 32, 64>}, {pipeline_mode = #tpu.pipeline_mode<synchronous>, transform_indices = @transform_8, window_bounds = array<i64: 1, 64>}, {pipeline_mode = #tpu.pipeline_mode<synchronous>, transform_indices = @transform_9, window_bounds = array<i64: 64, 32>}, {pipeline_mode = #tpu.pipeline_mode<synchronous>, transform_indices = @transform_10, window_bounds = array<i64: 1, 32>}, {pipeline_mode = #tpu.pipeline_mode<synchronous>, transform_indices = @transform_11, window_bounds = array<i64: 1, 32>}, {pipeline_mode = #tpu.pipeline_mode<synchronous>, transform_indices = @transform_12, window_bounds = array<i64: 1, 32>}, {transform_indices = @transform_13, window_bounds = array<i64: 2, 9, 32>}]} {
    %c0 = arith.constant 0 : index
    %c0_0 = arith.constant 0 : index
    %0 = vector.load %arg2[%c0, %c0_0] : memref<32x96xbf16, #tpu.memory_space<vmem>>, vector<32x96xbf16>
    %c0_1 = arith.constant 0 : index
    %c0_2 = arith.constant 0 : index
    %1 = vector.load %arg4[%c0_1, %c0_2] : memref<32x32xbf16, #tpu.memory_space<vmem>>, vector<32x32xbf16>
    %c0_3 = arith.constant 0 : index
    %c0_4 = arith.constant 0 : index
    %2 = vector.load %arg8[%c0_3, %c0_4] : memref<32x64xbf16, #tpu.memory_space<vmem>>, vector<32x64xbf16>
    %c0_5 = arith.constant 0 : index
    %c0_6 = arith.constant 0 : index
    %3 = vector.load %arg10[%c0_5, %c0_6] : memref<64x32xbf16, #tpu.memory_space<vmem>>, vector<64x32xbf16>
    %c0_7 = arith.constant 0 : index
    %c0_8 = arith.constant 0 : index
    %4 = vector.load %arg3[%c0_7, %c0_8] : memref<1x96xf32, #tpu.memory_space<vmem>>, vector<1x96xf32>
    %c0_9 = arith.constant 0 : index
    %c0_10 = arith.constant 0 : index
    %c0_11 = arith.constant 0 : index
    %5 = vector.load %arg1[%c0_9, %c0_10, %c0_11] : memref<2x9x32xf32, #tpu.memory_space<vmem>>, vector<1x9x32xf32>
    %6 = vector.shape_cast %5 : vector<1x9x32xf32> to vector<9x32xf32>
    %7 = arith.truncf %6 : vector<9x32xf32> to vector<9x32xbf16>
    %cst = arith.constant dense<0.000000e+00> : vector<9x96xf32>
    %8 = tpu.matmul %7, %0, %cst {dimension_numbers = #tpu.dot_dimension_numbers<[1], [0], [0], [1], [0, 0, 1, 1], [], []>} : vector<9x32xbf16>, vector<32x96xbf16>, vector<9x96xf32> -> vector<9x96xf32>
    %9 = vector.broadcast %4 : vector<1x96xf32> to vector<9x96xf32>
    %10 = arith.addf %8, %9 : vector<9x96xf32>
    %c1 = arith.constant 1 : index
    %c0_12 = arith.constant 0 : index
    %c0_13 = arith.constant 0 : index
    %11 = vector.load %arg1[%c1, %c0_12, %c0_13] : memref<2x9x32xf32, #tpu.memory_space<vmem>>, vector<1x9x32xf32>
    %12 = vector.shape_cast %11 : vector<1x9x32xf32> to vector<9x32xf32>
    %13 = arith.truncf %12 : vector<9x32xf32> to vector<9x32xbf16>
    %cst_14 = arith.constant dense<0.000000e+00> : vector<9x96xf32>
    %14 = tpu.matmul %13, %0, %cst_14 {dimension_numbers = #tpu.dot_dimension_numbers<[1], [0], [0], [1], [0, 0, 1, 1], [], []>} : vector<9x32xbf16>, vector<32x96xbf16>, vector<9x96xf32> -> vector<9x96xf32>
    %15 = vector.broadcast %4 : vector<1x96xf32> to vector<9x96xf32>
    %16 = arith.addf %14, %15 : vector<9x96xf32>
    %17 = vector.extract_strided_slice %10 {offsets = [0, 0], sizes = [9, 8], strides = [1, 1]} : vector<9x96xf32> to vector<9x8xf32>
    %cst_15 = arith.constant 0.353553385 : f32
    %18 = vector.broadcast %cst_15 : f32 to vector<9x8xf32>
    %19 = arith.mulf %17, %18 : vector<9x8xf32>
    %20 = vector.extract_strided_slice %10 {offsets = [0, 32], sizes = [9, 8], strides = [1, 1]} : vector<9x96xf32> to vector<9x8xf32>
    %21 = arith.mulf %19, %20 : vector<9x8xf32>
    %cst_16 = arith.constant dense<0.000000e+00> : vector<9xf32>
    %22 = vector.multi_reduction <add>, %21, %cst_16 [1] : vector<9x8xf32> to vector<9xf32>
    %23 = vector.shape_cast %22 : vector<9xf32> to vector<9x1xf32>
    %24 = vector.extract_strided_slice %16 {offsets = [0, 32], sizes = [9, 8], strides = [1, 1]} : vector<9x96xf32> to vector<9x8xf32>
    %25 = arith.mulf %19, %24 : vector<9x8xf32>
    %cst_17 = arith.constant dense<0.000000e+00> : vector<9xf32>
    %26 = vector.multi_reduction <add>, %25, %cst_17 [1] : vector<9x8xf32> to vector<9xf32>
    %27 = vector.shape_cast %26 : vector<9xf32> to vector<9x1xf32>
    %28 = arith.maximumf %23, %27 : vector<9x1xf32>
    %29 = arith.subf %23, %28 : vector<9x1xf32>
    %30 = math.exp %29 : vector<9x1xf32>
    %31 = arith.subf %27, %28 : vector<9x1xf32>
    %32 = math.exp %31 : vector<9x1xf32>
    %33 = arith.addf %30, %32 : vector<9x1xf32>
    %34 = tpu.reciprocal %33 {approx = true} : vector<9x1xf32> -> vector<9x1xf32>
    %35 = arith.mulf %30, %34 : vector<9x1xf32>
    %36 = vector.extract_strided_slice %10 {offsets = [0, 64], sizes = [9, 8], strides = [1, 1]} : vector<9x96xf32> to vector<9x8xf32>
    %37 = vector.broadcast %35 : vector<9x1xf32> to vector<9x8xf32>
    %38 = arith.mulf %37, %36 : vector<9x8xf32>
    %39 = arith.mulf %32, %34 : vector<9x1xf32>
    %40 = vector.extract_strided_slice %16 {offsets = [0, 64], sizes = [9, 8], strides = [1, 1]} : vector<9x96xf32> to vector<9x8xf32>
    %41 = vector.broadcast %39 : vector<9x1xf32> to vector<9x8xf32>
    %42 = arith.mulf %41, %40 : vector<9x8xf32>
    %43 = arith.addf %38, %42 : vector<9x8xf32>
    %44 = vector.extract_strided_slice %10 {offsets = [0, 8], sizes = [9, 8], strides = [1, 1]} : vector<9x96xf32> to vector<9x8xf32>
    %cst_18 = arith.constant 0.353553385 : f32
    %45 = vector.broadcast %cst_18 : f32 to vector<9x8xf32>
    %46 = arith.mulf %44, %45 : vector<9x8xf32>
    %47 = vector.extract_strided_slice %10 {offsets = [0, 40], sizes = [9, 8], strides = [1, 1]} : vector<9x96xf32> to vector<9x8xf32>
    %48 = arith.mulf %46, %47 : vector<9x8xf32>
    %cst_19 = arith.constant dense<0.000000e+00> : vector<9xf32>
    %49 = vector.multi_reduction <add>, %48, %cst_19 [1] : vector<9x8xf32> to vector<9xf32>
    %50 = vector.shape_cast %49 : vector<9xf32> to vector<9x1xf32>
    %51 = vector.extract_strided_slice %16 {offsets = [0, 40], sizes = [9, 8], strides = [1, 1]} : vector<9x96xf32> to vector<9x8xf32>
    %52 = arith.mulf %46, %51 : vector<9x8xf32>
    %cst_20 = arith.constant dense<0.000000e+00> : vector<9xf32>
    %53 = vector.multi_reduction <add>, %52, %cst_20 [1] : vector<9x8xf32> to vector<9xf32>
    %54 = vector.shape_cast %53 : vector<9xf32> to vector<9x1xf32>
    %55 = arith.maximumf %50, %54 : vector<9x1xf32>
    %56 = arith.subf %50, %55 : vector<9x1xf32>
    %57 = math.exp %56 : vector<9x1xf32>
    %58 = arith.subf %54, %55 : vector<9x1xf32>
    %59 = math.exp %58 : vector<9x1xf32>
    %60 = arith.addf %57, %59 : vector<9x1xf32>
    %61 = tpu.reciprocal %60 {approx = true} : vector<9x1xf32> -> vector<9x1xf32>
    %62 = arith.mulf %57, %61 : vector<9x1xf32>
    %63 = vector.extract_strided_slice %10 {offsets = [0, 72], sizes = [9, 8], strides = [1, 1]} : vector<9x96xf32> to vector<9x8xf32>
    %64 = vector.broadcast %62 : vector<9x1xf32> to vector<9x8xf32>
    %65 = arith.mulf %64, %63 : vector<9x8xf32>
    %66 = arith.mulf %59, %61 : vector<9x1xf32>
    %67 = vector.extract_strided_slice %16 {offsets = [0, 72], sizes = [9, 8], strides = [1, 1]} : vector<9x96xf32> to vector<9x8xf32>
    %68 = vector.broadcast %66 : vector<9x1xf32> to vector<9x8xf32>
    %69 = arith.mulf %68, %67 : vector<9x8xf32>
    %70 = arith.addf %65, %69 : vector<9x8xf32>
    %71 = vector.extract_strided_slice %10 {offsets = [0, 16], sizes = [9, 8], strides = [1, 1]} : vector<9x96xf32> to vector<9x8xf32>
    %cst_21 = arith.constant 0.353553385 : f32
    %72 = vector.broadcast %cst_21 : f32 to vector<9x8xf32>
    %73 = arith.mulf %71, %72 : vector<9x8xf32>
    %74 = vector.extract_strided_slice %10 {offsets = [0, 48], sizes = [9, 8], strides = [1, 1]} : vector<9x96xf32> to vector<9x8xf32>
    %75 = arith.mulf %73, %74 : vector<9x8xf32>
    %cst_22 = arith.constant dense<0.000000e+00> : vector<9xf32>
    %76 = vector.multi_reduction <add>, %75, %cst_22 [1] : vector<9x8xf32> to vector<9xf32>
    %77 = vector.shape_cast %76 : vector<9xf32> to vector<9x1xf32>
    %78 = vector.extract_strided_slice %16 {offsets = [0, 48], sizes = [9, 8], strides = [1, 1]} : vector<9x96xf32> to vector<9x8xf32>
    %79 = arith.mulf %73, %78 : vector<9x8xf32>
    %cst_23 = arith.constant dense<0.000000e+00> : vector<9xf32>
    %80 = vector.multi_reduction <add>, %79, %cst_23 [1] : vector<9x8xf32> to vector<9xf32>
    %81 = vector.shape_cast %80 : vector<9xf32> to vector<9x1xf32>
    %82 = arith.maximumf %77, %81 : vector<9x1xf32>
    %83 = arith.subf %77, %82 : vector<9x1xf32>
    %84 = math.exp %83 : vector<9x1xf32>
    %85 = arith.subf %81, %82 : vector<9x1xf32>
    %86 = math.exp %85 : vector<9x1xf32>
    %87 = arith.addf %84, %86 : vector<9x1xf32>
    %88 = tpu.reciprocal %87 {approx = true} : vector<9x1xf32> -> vector<9x1xf32>
    %89 = arith.mulf %84, %88 : vector<9x1xf32>
    %90 = vector.extract_strided_slice %10 {offsets = [0, 80], sizes = [9, 8], strides = [1, 1]} : vector<9x96xf32> to vector<9x8xf32>
    %91 = vector.broadcast %89 : vector<9x1xf32> to vector<9x8xf32>
    %92 = arith.mulf %91, %90 : vector<9x8xf32>
    %93 = arith.mulf %86, %88 : vector<9x1xf32>
    %94 = vector.extract_strided_slice %16 {offsets = [0, 80], sizes = [9, 8], strides = [1, 1]} : vector<9x96xf32> to vector<9x8xf32>
    %95 = vector.broadcast %93 : vector<9x1xf32> to vector<9x8xf32>
    %96 = arith.mulf %95, %94 : vector<9x8xf32>
    %97 = arith.addf %92, %96 : vector<9x8xf32>
    %98 = vector.extract_strided_slice %10 {offsets = [0, 24], sizes = [9, 8], strides = [1, 1]} : vector<9x96xf32> to vector<9x8xf32>
    %cst_24 = arith.constant 0.353553385 : f32
    %99 = vector.broadcast %cst_24 : f32 to vector<9x8xf32>
    %100 = arith.mulf %98, %99 : vector<9x8xf32>
    %101 = vector.extract_strided_slice %10 {offsets = [0, 56], sizes = [9, 8], strides = [1, 1]} : vector<9x96xf32> to vector<9x8xf32>
    %102 = arith.mulf %100, %101 : vector<9x8xf32>
    %cst_25 = arith.constant dense<0.000000e+00> : vector<9xf32>
    %103 = vector.multi_reduction <add>, %102, %cst_25 [1] : vector<9x8xf32> to vector<9xf32>
    %104 = vector.shape_cast %103 : vector<9xf32> to vector<9x1xf32>
    %105 = vector.extract_strided_slice %16 {offsets = [0, 56], sizes = [9, 8], strides = [1, 1]} : vector<9x96xf32> to vector<9x8xf32>
    %106 = arith.mulf %100, %105 : vector<9x8xf32>
    %cst_26 = arith.constant dense<0.000000e+00> : vector<9xf32>
    %107 = vector.multi_reduction <add>, %106, %cst_26 [1] : vector<9x8xf32> to vector<9xf32>
    %108 = vector.shape_cast %107 : vector<9xf32> to vector<9x1xf32>
    %109 = arith.maximumf %104, %108 : vector<9x1xf32>
    %110 = arith.subf %104, %109 : vector<9x1xf32>
    %111 = math.exp %110 : vector<9x1xf32>
    %112 = arith.subf %108, %109 : vector<9x1xf32>
    %113 = math.exp %112 : vector<9x1xf32>
    %114 = arith.addf %111, %113 : vector<9x1xf32>
    %115 = tpu.reciprocal %114 {approx = true} : vector<9x1xf32> -> vector<9x1xf32>
    %116 = arith.mulf %111, %115 : vector<9x1xf32>
    %117 = vector.extract_strided_slice %10 {offsets = [0, 88], sizes = [9, 8], strides = [1, 1]} : vector<9x96xf32> to vector<9x8xf32>
    %118 = vector.broadcast %116 : vector<9x1xf32> to vector<9x8xf32>
    %119 = arith.mulf %118, %117 : vector<9x8xf32>
    %120 = arith.mulf %113, %115 : vector<9x1xf32>
    %121 = vector.extract_strided_slice %16 {offsets = [0, 88], sizes = [9, 8], strides = [1, 1]} : vector<9x96xf32> to vector<9x8xf32>
    %122 = vector.broadcast %120 : vector<9x1xf32> to vector<9x8xf32>
    %123 = arith.mulf %122, %121 : vector<9x8xf32>
    %124 = arith.addf %119, %123 : vector<9x8xf32>
    %125 = tpu.concatenate %43, %70, %97, %124 in 1 : vector<9x8xf32>, vector<9x8xf32>, vector<9x8xf32>, vector<9x8xf32> -> vector<9x32xf32>
    %126 = arith.truncf %125 : vector<9x32xf32> to vector<9x32xbf16>
    %cst_27 = arith.constant dense<0.000000e+00> : vector<9x32xf32>
    %127 = tpu.matmul %126, %1, %cst_27 {dimension_numbers = #tpu.dot_dimension_numbers<[1], [0], [0], [1], [0, 0, 1, 1], [], []>} : vector<9x32xbf16>, vector<32x32xbf16>, vector<9x32xf32> -> vector<9x32xf32>
    %c0_28 = arith.constant 0 : index
    %c0_29 = arith.constant 0 : index
    %128 = vector.load %arg5[%c0_28, %c0_29] : memref<1x32xf32, #tpu.memory_space<vmem>>, vector<1x32xf32>
    %129 = vector.broadcast %128 : vector<1x32xf32> to vector<9x32xf32>
    %130 = arith.addf %127, %129 : vector<9x32xf32>
    %131 = arith.addf %130, %6 : vector<9x32xf32>
    %cst_30 = arith.constant dense<0.000000e+00> : vector<9xf32>
    %132 = vector.multi_reduction <add>, %131, %cst_30 [1] : vector<9x32xf32> to vector<9xf32>
    %133 = vector.shape_cast %132 : vector<9xf32> to vector<9x1xf32>
    %cst_31 = arith.constant 3.200000e+01 : f32
    %134 = vector.broadcast %cst_31 : f32 to vector<9x1xf32>
    %135 = arith.divf %133, %134 : vector<9x1xf32>
    %136 = vector.broadcast %135 : vector<9x1xf32> to vector<9x32xf32>
    %137 = arith.subf %131, %136 : vector<9x32xf32>
    %138 = arith.mulf %137, %137 : vector<9x32xf32>
    %cst_32 = arith.constant dense<0.000000e+00> : vector<9xf32>
    %139 = vector.multi_reduction <add>, %138, %cst_32 [1] : vector<9x32xf32> to vector<9xf32>
    %140 = vector.shape_cast %139 : vector<9xf32> to vector<9x1xf32>
    %cst_33 = arith.constant 3.200000e+01 : f32
    %141 = vector.broadcast %cst_33 : f32 to vector<9x1xf32>
    %142 = arith.divf %140, %141 : vector<9x1xf32>
    %cst_34 = arith.constant 9.99999974E-6 : f32
    %143 = vector.broadcast %cst_34 : f32 to vector<9x1xf32>
    %144 = arith.addf %142, %143 : vector<9x1xf32>
    %145 = math.rsqrt %144 : vector<9x1xf32>
    %146 = vector.broadcast %145 : vector<9x1xf32> to vector<9x32xf32>
    %147 = arith.mulf %137, %146 : vector<9x32xf32>
    %c0_35 = arith.constant 0 : index
    %c0_36 = arith.constant 0 : index
    %148 = vector.load %arg6[%c0_35, %c0_36] : memref<1x32xf32, #tpu.memory_space<vmem>>, vector<1x32xf32>
    %149 = vector.broadcast %148 : vector<1x32xf32> to vector<9x32xf32>
    %150 = arith.mulf %147, %149 : vector<9x32xf32>
    %c0_37 = arith.constant 0 : index
    %c0_38 = arith.constant 0 : index
    %151 = vector.load %arg7[%c0_37, %c0_38] : memref<1x32xf32, #tpu.memory_space<vmem>>, vector<1x32xf32>
    %152 = vector.broadcast %151 : vector<1x32xf32> to vector<9x32xf32>
    %153 = arith.addf %150, %152 : vector<9x32xf32>
    %154 = arith.truncf %153 : vector<9x32xf32> to vector<9x32xbf16>
    %cst_39 = arith.constant dense<0.000000e+00> : vector<9x64xf32>
    %155 = tpu.matmul %154, %2, %cst_39 {dimension_numbers = #tpu.dot_dimension_numbers<[1], [0], [0], [1], [0, 0, 1, 1], [], []>} : vector<9x32xbf16>, vector<32x64xbf16>, vector<9x64xf32> -> vector<9x64xf32>
    %c0_40 = arith.constant 0 : index
    %c0_41 = arith.constant 0 : index
    %156 = vector.load %arg9[%c0_40, %c0_41] : memref<1x64xf32, #tpu.memory_space<vmem>>, vector<1x64xf32>
    %157 = vector.broadcast %156 : vector<1x64xf32> to vector<9x64xf32>
    %158 = arith.addf %155, %157 : vector<9x64xf32>
    %cst_42 = arith.constant 0.000000e+00 : f32
    %159 = vector.broadcast %cst_42 : f32 to vector<9x64xf32>
    %160 = arith.maximumf %158, %159 : vector<9x64xf32>
    %161 = arith.truncf %160 : vector<9x64xf32> to vector<9x64xbf16>
    %cst_43 = arith.constant dense<0.000000e+00> : vector<9x32xf32>
    %162 = tpu.matmul %161, %3, %cst_43 {dimension_numbers = #tpu.dot_dimension_numbers<[1], [0], [0], [1], [0, 0, 1, 1], [], []>} : vector<9x64xbf16>, vector<64x32xbf16>, vector<9x32xf32> -> vector<9x32xf32>
    %c0_44 = arith.constant 0 : index
    %c0_45 = arith.constant 0 : index
    %163 = vector.load %arg11[%c0_44, %c0_45] : memref<1x32xf32, #tpu.memory_space<vmem>>, vector<1x32xf32>
    %164 = vector.broadcast %163 : vector<1x32xf32> to vector<9x32xf32>
    %165 = arith.addf %162, %164 : vector<9x32xf32>
    %166 = arith.addf %165, %153 : vector<9x32xf32>
    %cst_46 = arith.constant dense<0.000000e+00> : vector<9xf32>
    %167 = vector.multi_reduction <add>, %166, %cst_46 [1] : vector<9x32xf32> to vector<9xf32>
    %168 = vector.shape_cast %167 : vector<9xf32> to vector<9x1xf32>
    %cst_47 = arith.constant 3.200000e+01 : f32
    %169 = vector.broadcast %cst_47 : f32 to vector<9x1xf32>
    %170 = arith.divf %168, %169 : vector<9x1xf32>
    %171 = vector.broadcast %170 : vector<9x1xf32> to vector<9x32xf32>
    %172 = arith.subf %166, %171 : vector<9x32xf32>
    %173 = arith.mulf %172, %172 : vector<9x32xf32>
    %cst_48 = arith.constant dense<0.000000e+00> : vector<9xf32>
    %174 = vector.multi_reduction <add>, %173, %cst_48 [1] : vector<9x32xf32> to vector<9xf32>
    %175 = vector.shape_cast %174 : vector<9xf32> to vector<9x1xf32>
    %cst_49 = arith.constant 3.200000e+01 : f32
    %176 = vector.broadcast %cst_49 : f32 to vector<9x1xf32>
    %177 = arith.divf %175, %176 : vector<9x1xf32>
    %cst_50 = arith.constant 9.99999974E-6 : f32
    %178 = vector.broadcast %cst_50 : f32 to vector<9x1xf32>
    %179 = arith.addf %177, %178 : vector<9x1xf32>
    %180 = math.rsqrt %179 : vector<9x1xf32>
    %181 = vector.broadcast %180 : vector<9x1xf32> to vector<9x32xf32>
    %182 = arith.mulf %172, %181 : vector<9x32xf32>
    %c0_51 = arith.constant 0 : index
    %c0_52 = arith.constant 0 : index
    %183 = vector.load %arg12[%c0_51, %c0_52] : memref<1x32xf32, #tpu.memory_space<vmem>>, vector<1x32xf32>
    %184 = vector.broadcast %183 : vector<1x32xf32> to vector<9x32xf32>
    %185 = arith.mulf %182, %184 : vector<9x32xf32>
    %c0_53 = arith.constant 0 : index
    %c0_54 = arith.constant 0 : index
    %186 = vector.load %arg13[%c0_53, %c0_54] : memref<1x32xf32, #tpu.memory_space<vmem>>, vector<1x32xf32>
    %187 = vector.broadcast %186 : vector<1x32xf32> to vector<9x32xf32>
    %188 = arith.addf %185, %187 : vector<9x32xf32>
    %c0_55 = arith.constant 0 : index
    %c0_56 = arith.constant 0 : index
    %c0_57 = arith.constant 0 : index
    %189 = vector.load %arg14[%c0_55, %c0_56, %c0_57] : memref<2x9x32xf32, #tpu.memory_space<vmem>>, vector<1x9x32xf32>
    %190 = vector.shape_cast %189 : vector<1x9x32xf32> to vector<9x32xf32>
    %191 = vector.shape_cast %188 : vector<9x32xf32> to vector<1x9x32xf32>
    tpu.vector_store %arg14[%c0_55, %c0_56, %c0_57], %191 {strides = array<i32>} : memref<2x9x32xf32, #tpu.memory_space<vmem>>, vector<1x9x32xf32>,
    %192 = vector.extract_strided_slice %16 {offsets = [0, 0], sizes = [9, 8], strides = [1, 1]} : vector<9x96xf32> to vector<9x8xf32>
    %cst_58 = arith.constant 0.353553385 : f32
    %193 = vector.broadcast %cst_58 : f32 to vector<9x8xf32>
    %194 = arith.mulf %192, %193 : vector<9x8xf32>
    %195 = vector.extract_strided_slice %10 {offsets = [0, 32], sizes = [9, 8], strides = [1, 1]} : vector<9x96xf32> to vector<9x8xf32>
    %196 = arith.mulf %194, %195 : vector<9x8xf32>
    %cst_59 = arith.constant dense<0.000000e+00> : vector<9xf32>
    %197 = vector.multi_reduction <add>, %196, %cst_59 [1] : vector<9x8xf32> to vector<9xf32>
    %198 = vector.shape_cast %197 : vector<9xf32> to vector<9x1xf32>
    %199 = vector.extract_strided_slice %16 {offsets = [0, 32], sizes = [9, 8], strides = [1, 1]} : vector<9x96xf32> to vector<9x8xf32>
    %200 = arith.mulf %194, %199 : vector<9x8xf32>
    %cst_60 = arith.constant dense<0.000000e+00> : vector<9xf32>
    %201 = vector.multi_reduction <add>, %200, %cst_60 [1] : vector<9x8xf32> to vector<9xf32>
    %202 = vector.shape_cast %201 : vector<9xf32> to vector<9x1xf32>
    %203 = arith.maximumf %198, %202 : vector<9x1xf32>
    %204 = arith.subf %198, %203 : vector<9x1xf32>
    %205 = math.exp %204 : vector<9x1xf32>
    %206 = arith.subf %202, %203 : vector<9x1xf32>
    %207 = math.exp %206 : vector<9x1xf32>
    %208 = arith.addf %205, %207 : vector<9x1xf32>
    %209 = tpu.reciprocal %208 {approx = true} : vector<9x1xf32> -> vector<9x1xf32>
    %210 = arith.mulf %205, %209 : vector<9x1xf32>
    %211 = vector.extract_strided_slice %10 {offsets = [0, 64], sizes = [9, 8], strides = [1, 1]} : vector<9x96xf32> to vector<9x8xf32>
    %212 = vector.broadcast %210 : vector<9x1xf32> to vector<9x8xf32>
    %213 = arith.mulf %212, %211 : vector<9x8xf32>
    %214 = arith.mulf %207, %209 : vector<9x1xf32>
    %215 = vector.extract_strided_slice %16 {offsets = [0, 64], sizes = [9, 8], strides = [1, 1]} : vector<9x96xf32> to vector<9x8xf32>
    %216 = vector.broadcast %214 : vector<9x1xf32> to vector<9x8xf32>
    %217 = arith.mulf %216, %215 : vector<9x8xf32>
    %218 = arith.addf %213, %217 : vector<9x8xf32>
    %219 = vector.extract_strided_slice %16 {offsets = [0, 8], sizes = [9, 8], strides = [1, 1]} : vector<9x96xf32> to vector<9x8xf32>
    %cst_61 = arith.constant 0.353553385 : f32
    %220 = vector.broadcast %cst_61 : f32 to vector<9x8xf32>
    %221 = arith.mulf %219, %220 : vector<9x8xf32>
    %222 = vector.extract_strided_slice %10 {offsets = [0, 40], sizes = [9, 8], strides = [1, 1]} : vector<9x96xf32> to vector<9x8xf32>
    %223 = arith.mulf %221, %222 : vector<9x8xf32>
    %cst_62 = arith.constant dense<0.000000e+00> : vector<9xf32>
    %224 = vector.multi_reduction <add>, %223, %cst_62 [1] : vector<9x8xf32> to vector<9xf32>
    %225 = vector.shape_cast %224 : vector<9xf32> to vector<9x1xf32>
    %226 = vector.extract_strided_slice %16 {offsets = [0, 40], sizes = [9, 8], strides = [1, 1]} : vector<9x96xf32> to vector<9x8xf32>
    %227 = arith.mulf %221, %226 : vector<9x8xf32>
    %cst_63 = arith.constant dense<0.000000e+00> : vector<9xf32>
    %228 = vector.multi_reduction <add>, %227, %cst_63 [1] : vector<9x8xf32> to vector<9xf32>
    %229 = vector.shape_cast %228 : vector<9xf32> to vector<9x1xf32>
    %230 = arith.maximumf %225, %229 : vector<9x1xf32>
    %231 = arith.subf %225, %230 : vector<9x1xf32>
    %232 = math.exp %231 : vector<9x1xf32>
    %233 = arith.subf %229, %230 : vector<9x1xf32>
    %234 = math.exp %233 : vector<9x1xf32>
    %235 = arith.addf %232, %234 : vector<9x1xf32>
    %236 = tpu.reciprocal %235 {approx = true} : vector<9x1xf32> -> vector<9x1xf32>
    %237 = arith.mulf %232, %236 : vector<9x1xf32>
    %238 = vector.extract_strided_slice %10 {offsets = [0, 72], sizes = [9, 8], strides = [1, 1]} : vector<9x96xf32> to vector<9x8xf32>
    %239 = vector.broadcast %237 : vector<9x1xf32> to vector<9x8xf32>
    %240 = arith.mulf %239, %238 : vector<9x8xf32>
    %241 = arith.mulf %234, %236 : vector<9x1xf32>
    %242 = vector.extract_strided_slice %16 {offsets = [0, 72], sizes = [9, 8], strides = [1, 1]} : vector<9x96xf32> to vector<9x8xf32>
    %243 = vector.broadcast %241 : vector<9x1xf32> to vector<9x8xf32>
    %244 = arith.mulf %243, %242 : vector<9x8xf32>
    %245 = arith.addf %240, %244 : vector<9x8xf32>
    %246 = vector.extract_strided_slice %16 {offsets = [0, 16], sizes = [9, 8], strides = [1, 1]} : vector<9x96xf32> to vector<9x8xf32>
    %cst_64 = arith.constant 0.353553385 : f32
    %247 = vector.broadcast %cst_64 : f32 to vector<9x8xf32>
    %248 = arith.mulf %246, %247 : vector<9x8xf32>
    %249 = vector.extract_strided_slice %10 {offsets = [0, 48], sizes = [9, 8], strides = [1, 1]} : vector<9x96xf32> to vector<9x8xf32>
    %250 = arith.mulf %248, %249 : vector<9x8xf32>
    %cst_65 = arith.constant dense<0.000000e+00> : vector<9xf32>
    %251 = vector.multi_reduction <add>, %250, %cst_65 [1] : vector<9x8xf32> to vector<9xf32>
    %252 = vector.shape_cast %251 : vector<9xf32> to vector<9x1xf32>
    %253 = vector.extract_strided_slice %16 {offsets = [0, 48], sizes = [9, 8], strides = [1, 1]} : vector<9x96xf32> to vector<9x8xf32>
    %254 = arith.mulf %248, %253 : vector<9x8xf32>
    %cst_66 = arith.constant dense<0.000000e+00> : vector<9xf32>
    %255 = vector.multi_reduction <add>, %254, %cst_66 [1] : vector<9x8xf32> to vector<9xf32>
    %256 = vector.shape_cast %255 : vector<9xf32> to vector<9x1xf32>
    %257 = arith.maximumf %252, %256 : vector<9x1xf32>
    %258 = arith.subf %252, %257 : vector<9x1xf32>
    %259 = math.exp %258 : vector<9x1xf32>
    %260 = arith.subf %256, %257 : vector<9x1xf32>
    %261 = math.exp %260 : vector<9x1xf32>
    %262 = arith.addf %259, %261 : vector<9x1xf32>
    %263 = tpu.reciprocal %262 {approx = true} : vector<9x1xf32> -> vector<9x1xf32>
    %264 = arith.mulf %259, %263 : vector<9x1xf32>
    %265 = vector.extract_strided_slice %10 {offsets = [0, 80], sizes = [9, 8], strides = [1, 1]} : vector<9x96xf32> to vector<9x8xf32>
    %266 = vector.broadcast %264 : vector<9x1xf32> to vector<9x8xf32>
    %267 = arith.mulf %266, %265 : vector<9x8xf32>
    %268 = arith.mulf %261, %263 : vector<9x1xf32>
    %269 = vector.extract_strided_slice %16 {offsets = [0, 80], sizes = [9, 8], strides = [1, 1]} : vector<9x96xf32> to vector<9x8xf32>
    %270 = vector.broadcast %268 : vector<9x1xf32> to vector<9x8xf32>
    %271 = arith.mulf %270, %269 : vector<9x8xf32>
    %272 = arith.addf %267, %271 : vector<9x8xf32>
    %273 = vector.extract_strided_slice %16 {offsets = [0, 24], sizes = [9, 8], strides = [1, 1]} : vector<9x96xf32> to vector<9x8xf32>
    %cst_67 = arith.constant 0.353553385 : f32
    %274 = vector.broadcast %cst_67 : f32 to vector<9x8xf32>
    %275 = arith.mulf %273, %274 : vector<9x8xf32>
    %276 = vector.extract_strided_slice %10 {offsets = [0, 56], sizes = [9, 8], strides = [1, 1]} : vector<9x96xf32> to vector<9x8xf32>
    %277 = arith.mulf %275, %276 : vector<9x8xf32>
    %cst_68 = arith.constant dense<0.000000e+00> : vector<9xf32>
    %278 = vector.multi_reduction <add>, %277, %cst_68 [1] : vector<9x8xf32> to vector<9xf32>
    %279 = vector.shape_cast %278 : vector<9xf32> to vector<9x1xf32>
    %280 = vector.extract_strided_slice %16 {offsets = [0, 56], sizes = [9, 8], strides = [1, 1]} : vector<9x96xf32> to vector<9x8xf32>
    %281 = arith.mulf %275, %280 : vector<9x8xf32>
    %cst_69 = arith.constant dense<0.000000e+00> : vector<9xf32>
    %282 = vector.multi_reduction <add>, %281, %cst_69 [1] : vector<9x8xf32> to vector<9xf32>
    %283 = vector.shape_cast %282 : vector<9xf32> to vector<9x1xf32>
    %284 = arith.maximumf %279, %283 : vector<9x1xf32>
    %285 = arith.subf %279, %284 : vector<9x1xf32>
    %286 = math.exp %285 : vector<9x1xf32>
    %287 = arith.subf %283, %284 : vector<9x1xf32>
    %288 = math.exp %287 : vector<9x1xf32>
    %289 = arith.addf %286, %288 : vector<9x1xf32>
    %290 = tpu.reciprocal %289 {approx = true} : vector<9x1xf32> -> vector<9x1xf32>
    %291 = arith.mulf %286, %290 : vector<9x1xf32>
    %292 = vector.extract_strided_slice %10 {offsets = [0, 88], sizes = [9, 8], strides = [1, 1]} : vector<9x96xf32> to vector<9x8xf32>
    %293 = vector.broadcast %291 : vector<9x1xf32> to vector<9x8xf32>
    %294 = arith.mulf %293, %292 : vector<9x8xf32>
    %295 = arith.mulf %288, %290 : vector<9x1xf32>
    %296 = vector.extract_strided_slice %16 {offsets = [0, 88], sizes = [9, 8], strides = [1, 1]} : vector<9x96xf32> to vector<9x8xf32>
    %297 = vector.broadcast %295 : vector<9x1xf32> to vector<9x8xf32>
    %298 = arith.mulf %297, %296 : vector<9x8xf32>
    %299 = arith.addf %294, %298 : vector<9x8xf32>
    %300 = tpu.concatenate %218, %245, %272, %299 in 1 : vector<9x8xf32>, vector<9x8xf32>, vector<9x8xf32>, vector<9x8xf32> -> vector<9x32xf32>
    %301 = arith.truncf %300 : vector<9x32xf32> to vector<9x32xbf16>
    %cst_70 = arith.constant dense<0.000000e+00> : vector<9x32xf32>
    %302 = tpu.matmul %301, %1, %cst_70 {dimension_numbers = #tpu.dot_dimension_numbers<[1], [0], [0], [1], [0, 0, 1, 1], [], []>} : vector<9x32xbf16>, vector<32x32xbf16>, vector<9x32xf32> -> vector<9x32xf32>
    %c0_71 = arith.constant 0 : index
    %c0_72 = arith.constant 0 : index
    %303 = vector.load %arg5[%c0_71, %c0_72] : memref<1x32xf32, #tpu.memory_space<vmem>>, vector<1x32xf32>
    %304 = vector.broadcast %303 : vector<1x32xf32> to vector<9x32xf32>
    %305 = arith.addf %302, %304 : vector<9x32xf32>
    %306 = arith.addf %305, %12 : vector<9x32xf32>
    %cst_73 = arith.constant dense<0.000000e+00> : vector<9xf32>
    %307 = vector.multi_reduction <add>, %306, %cst_73 [1] : vector<9x32xf32> to vector<9xf32>
    %308 = vector.shape_cast %307 : vector<9xf32> to vector<9x1xf32>
    %cst_74 = arith.constant 3.200000e+01 : f32
    %309 = vector.broadcast %cst_74 : f32 to vector<9x1xf32>
    %310 = arith.divf %308, %309 : vector<9x1xf32>
    %311 = vector.broadcast %310 : vector<9x1xf32> to vector<9x32xf32>
    %312 = arith.subf %306, %311 : vector<9x32xf32>
    %313 = arith.mulf %312, %312 : vector<9x32xf32>
    %cst_75 = arith.constant dense<0.000000e+00> : vector<9xf32>
    %314 = vector.multi_reduction <add>, %313, %cst_75 [1] : vector<9x32xf32> to vector<9xf32>
    %315 = vector.shape_cast %314 : vector<9xf32> to vector<9x1xf32>
    %cst_76 = arith.constant 3.200000e+01 : f32
    %316 = vector.broadcast %cst_76 : f32 to vector<9x1xf32>
    %317 = arith.divf %315, %316 : vector<9x1xf32>
    %cst_77 = arith.constant 9.99999974E-6 : f32
    %318 = vector.broadcast %cst_77 : f32 to vector<9x1xf32>
    %319 = arith.addf %317, %318 : vector<9x1xf32>
    %320 = math.rsqrt %319 : vector<9x1xf32>
    %321 = vector.broadcast %320 : vector<9x1xf32> to vector<9x32xf32>
    %322 = arith.mulf %312, %321 : vector<9x32xf32>
    %c0_78 = arith.constant 0 : index
    %c0_79 = arith.constant 0 : index
    %323 = vector.load %arg6[%c0_78, %c0_79] : memref<1x32xf32, #tpu.memory_space<vmem>>, vector<1x32xf32>
    %324 = vector.broadcast %323 : vector<1x32xf32> to vector<9x32xf32>
    %325 = arith.mulf %322, %324 : vector<9x32xf32>
    %c0_80 = arith.constant 0 : index
    %c0_81 = arith.constant 0 : index
    %326 = vector.load %arg7[%c0_80, %c0_81] : memref<1x32xf32, #tpu.memory_space<vmem>>, vector<1x32xf32>
    %327 = vector.broadcast %326 : vector<1x32xf32> to vector<9x32xf32>
    %328 = arith.addf %325, %327 : vector<9x32xf32>
    %329 = arith.truncf %328 : vector<9x32xf32> to vector<9x32xbf16>
    %cst_82 = arith.constant dense<0.000000e+00> : vector<9x64xf32>
    %330 = tpu.matmul %329, %2, %cst_82 {dimension_numbers = #tpu.dot_dimension_numbers<[1], [0], [0], [1], [0, 0, 1, 1], [], []>} : vector<9x32xbf16>, vector<32x64xbf16>, vector<9x64xf32> -> vector<9x64xf32>
    %c0_83 = arith.constant 0 : index
    %c0_84 = arith.constant 0 : index
    %331 = vector.load %arg9[%c0_83, %c0_84] : memref<1x64xf32, #tpu.memory_space<vmem>>, vector<1x64xf32>
    %332 = vector.broadcast %331 : vector<1x64xf32> to vector<9x64xf32>
    %333 = arith.addf %330, %332 : vector<9x64xf32>
    %cst_85 = arith.constant 0.000000e+00 : f32
    %334 = vector.broadcast %cst_85 : f32 to vector<9x64xf32>
    %335 = arith.maximumf %333, %334 : vector<9x64xf32>
    %336 = arith.truncf %335 : vector<9x64xf32> to vector<9x64xbf16>
    %cst_86 = arith.constant dense<0.000000e+00> : vector<9x32xf32>
    %337 = tpu.matmul %336, %3, %cst_86 {dimension_numbers = #tpu.dot_dimension_numbers<[1], [0], [0], [1], [0, 0, 1, 1], [], []>} : vector<9x64xbf16>, vector<64x32xbf16>, vector<9x32xf32> -> vector<9x32xf32>
    %c0_87 = arith.constant 0 : index
    %c0_88 = arith.constant 0 : index
    %338 = vector.load %arg11[%c0_87, %c0_88] : memref<1x32xf32, #tpu.memory_space<vmem>>, vector<1x32xf32>
    %339 = vector.broadcast %338 : vector<1x32xf32> to vector<9x32xf32>
    %340 = arith.addf %337, %339 : vector<9x32xf32>
    %341 = arith.addf %340, %328 : vector<9x32xf32>
    %cst_89 = arith.constant dense<0.000000e+00> : vector<9xf32>
    %342 = vector.multi_reduction <add>, %341, %cst_89 [1] : vector<9x32xf32> to vector<9xf32>
    %343 = vector.shape_cast %342 : vector<9xf32> to vector<9x1xf32>
    %cst_90 = arith.constant 3.200000e+01 : f32
    %344 = vector.broadcast %cst_90 : f32 to vector<9x1xf32>
    %345 = arith.divf %343, %344 : vector<9x1xf32>
    %346 = vector.broadcast %345 : vector<9x1xf32> to vector<9x32xf32>
    %347 = arith.subf %341, %346 : vector<9x32xf32>
    %348 = arith.mulf %347, %347 : vector<9x32xf32>
    %cst_91 = arith.constant dense<0.000000e+00> : vector<9xf32>
    %349 = vector.multi_reduction <add>, %348, %cst_91 [1] : vector<9x32xf32> to vector<9xf32>
    %350 = vector.shape_cast %349 : vector<9xf32> to vector<9x1xf32>
    %cst_92 = arith.constant 3.200000e+01 : f32
    %351 = vector.broadcast %cst_92 : f32 to vector<9x1xf32>
    %352 = arith.divf %350, %351 : vector<9x1xf32>
    %cst_93 = arith.constant 9.99999974E-6 : f32
    %353 = vector.broadcast %cst_93 : f32 to vector<9x1xf32>
    %354 = arith.addf %352, %353 : vector<9x1xf32>
    %355 = math.rsqrt %354 : vector<9x1xf32>
    %356 = vector.broadcast %355 : vector<9x1xf32> to vector<9x32xf32>
    %357 = arith.mulf %347, %356 : vector<9x32xf32>
    %c0_94 = arith.constant 0 : index
    %c0_95 = arith.constant 0 : index
    %358 = vector.load %arg12[%c0_94, %c0_95] : memref<1x32xf32, #tpu.memory_space<vmem>>, vector<1x32xf32>
    %359 = vector.broadcast %358 : vector<1x32xf32> to vector<9x32xf32>
    %360 = arith.mulf %357, %359 : vector<9x32xf32>
    %c0_96 = arith.constant 0 : index
    %c0_97 = arith.constant 0 : index
    %361 = vector.load %arg13[%c0_96, %c0_97] : memref<1x32xf32, #tpu.memory_space<vmem>>, vector<1x32xf32>
    %362 = vector.broadcast %361 : vector<1x32xf32> to vector<9x32xf32>
    %363 = arith.addf %360, %362 : vector<9x32xf32>
    %c1_98 = arith.constant 1 : index
    %c0_99 = arith.constant 0 : index
    %c0_100 = arith.constant 0 : index
    %364 = vector.load %arg14[%c1_98, %c0_99, %c0_100] : memref<2x9x32xf32, #tpu.memory_space<vmem>>, vector<1x9x32xf32>
    %365 = vector.shape_cast %364 : vector<1x9x32xf32> to vector<9x32xf32>
    %366 = vector.shape_cast %363 : vector<9x32xf32> to vector<1x9x32xf32>
    tpu.vector_store %arg14[%c1_98, %c0_99, %c0_100], %366 {strides = array<i32>} : memref<2x9x32xf32, #tpu.memory_space<vmem>>, vector<1x9x32xf32>,
    return
  }
  func.func @transform_0(%arg0: i32) -> (i32, i32, i32) {
    %c0_i32 = arith.constant 0 : i32
    %c0_i32_0 = arith.constant 0 : i32
    %c0_i32_1 = arith.constant 0 : i32
    return %c0_i32, %arg0, %c0_i32_0 : i32, i32, i32
  }
  func.func @transform_1(%arg0: i32) -> (i32, i32) {
    %c0_i32 = arith.constant 0 : i32
    %c0_i32_0 = arith.constant 0 : i32
    %c0_i32_1 = arith.constant 0 : i32
    return %c0_i32, %c0_i32_0 : i32, i32
  }
  func.func @transform_2(%arg0: i32) -> (i32, i32) {
    %c0_i32 = arith.constant 0 : i32
    %c0_i32_0 = arith.constant 0 : i32
    %c0_i32_1 = arith.constant 0 : i32
    return %c0_i32, %c0_i32_0 : i32, i32
  }
  func.func @transform_3(%arg0: i32) -> (i32, i32) {
    %c0_i32 = arith.constant 0 : i32
    %c0_i32_0 = arith.constant 0 : i32
    %c0_i32_1 = arith.constant 0 : i32
    return %c0_i32, %c0_i32_0 : i32, i32
  }
  func.func @transform_4(%arg0: i32) -> (i32, i32) {
    %c0_i32 = arith.constant 0 : i32
    %c0_i32_0 = arith.constant 0 : i32
    %c0_i32_1 = arith.constant 0 : i32
    return %c0_i32, %c0_i32_0 : i32, i32
  }
  func.func @transform_5(%arg0: i32) -> (i32, i32) {
    %c0_i32 = arith.constant 0 : i32
    %c0_i32_0 = arith.constant 0 : i32
    %c0_i32_1 = arith.constant 0 : i32
    return %c0_i32, %c0_i32_0 : i32, i32
  }
  func.func @transform_6(%arg0: i32) -> (i32, i32) {
    %c0_i32 = arith.constant 0 : i32
    %c0_i32_0 = arith.constant 0 : i32
    %c0_i32_1 = arith.constant 0 : i32
    return %c0_i32, %c0_i32_0 : i32, i32
  }
  func.func @transform_7(%arg0: i32) -> (i32, i32) {
    %c0_i32 = arith.constant 0 : i32
    %c0_i32_0 = arith.constant 0 : i32
    %c0_i32_1 = arith.constant 0 : i32
    return %c0_i32, %c0_i32_0 : i32, i32
  }
  func.func @transform_8(%arg0: i32) -> (i32, i32) {
    %c0_i32 = arith.constant 0 : i32
    %c0_i32_0 = arith.constant 0 : i32
    %c0_i32_1 = arith.constant 0 : i32
    return %c0_i32, %c0_i32_0 : i32, i32
  }
  func.func @transform_9(%arg0: i32) -> (i32, i32) {
    %c0_i32 = arith.constant 0 : i32
    %c0_i32_0 = arith.constant 0 : i32
    %c0_i32_1 = arith.constant 0 : i32
    return %c0_i32, %c0_i32_0 : i32, i32
  }
  func.func @transform_10(%arg0: i32) -> (i32, i32) {
    %c0_i32 = arith.constant 0 : i32
    %c0_i32_0 = arith.constant 0 : i32
    %c0_i32_1 = arith.constant 0 : i32
    return %c0_i32, %c0_i32_0 : i32, i32
  }
  func.func @transform_11(%arg0: i32) -> (i32, i32) {
    %c0_i32 = arith.constant 0 : i32
    %c0_i32_0 = arith.constant 0 : i32
    %c0_i32_1 = arith.constant 0 : i32
    return %c0_i32, %c0_i32_0 : i32, i32
  }
  func.func @transform_12(%arg0: i32) -> (i32, i32) {
    %c0_i32 = arith.constant 0 : i32
    %c0_i32_0 = arith.constant 0 : i32
    %c0_i32_1 = arith.constant 0 : i32
    return %c0_i32, %c0_i32_0 : i32, i32
  }
  func.func @transform_13(%arg0: i32) -> (i32, i32, i32) {
    %c0_i32 = arith.constant 0 : i32
    %c0_i32_0 = arith.constant 0 : i32
    %c0_i32_1 = arith.constant 0 : i32
    return %c0_i32, %arg0, %c0_i32_0 : i32, i32, i32
  }
}

</mosaic_0001>

<bundles_post_ra>
// kernel: vit_forward.7
= control target key start
LH: loop header
LB: loop body
LE: loop exit
PB: predicated region body
PF: predicated region fallthrough
CT: control target
= control target key end

     0   :  { %vm19_vm0 = vcmask 261120   ;;  %v203_v1 = vmov 0.0   ;;  %vm204_vm1 = vmmov 0   ;;  %vm21_vm2 = vcmask 253952   ;;  %s262_s0 = inlined_call_operand.vmem [shape: f32[2,9,32], index: 0, kind: input, shape index: {}]   ;;  %s263_s1 = inlined_call_operand.vmem [shape: f32[32,4], index: 1, kind: input, shape index: {}]   ;;  %s264_s2 = inlined_call_operand.vmem [shape: f32[1,4], index: 2, kind: input, shape index: {}]   ;;  %s265_s3 = inlined_call_operand.hbm [shape: f32[2,4], index: 3, kind: output, shape index: {}]  }
   0x1   :  { %v45_v0 = vld [vmem:[%s263_s1 + $0x18] sm:$0xff]  ;;  %163 = vmatprep.subr.mxu0 %v203_v1  ;;  %v44_v2 = vld [vmem:[%s263_s1 + $0x10] sm:$0xff]  ;;  %171 = vmatprep.mubr.msk.f32.mxu0 %vm204_vm1, %v203_v1  ;;  %v15_v3 = vld [vmem:[%s262_s0] sm:$0xff] }
   0x2   :  { %v16_v4 = vld [vmem:[%s262_s0 + $0x8] sm:$0x1]  ;;  %164 = vmatpush3.msra.mxu0 %v45_v0  ;;  %v17_v5 = vld [vmem:[%s262_s0 + $0x10] sm:$0xff]  ;;  %v18_v6 = vld [vmem:[%s262_s0 + $0x18] sm:$0x1]  ;;  %v20_v7 = vsel %vm19_vm0, %v15_v3, 0.0 }
   0x3   :  { %v22_v8 = vsel %vm21_vm2, %v16_v4, 0.0  ;;  %165 = vmatprep.subr.mxu0 %v203_v1  ;;  %v43_v9 = vld [vmem:[%s263_s1 + $0x8] sm:$0xff]  ;;  %v30_v11 = vsel %vm19_vm0, %v17_v5, 0.0  ;;  %v31_v12 = vsel %vm21_vm2, %v18_v6, 0.0 }
   0x4   :  { %v23_v10 = vadd.f32 %v22_v8, %v20_v7 }
   0x5   :  { %8 = vsyncpa [#allocation3], 0  ;;  %166 = vmatpush3.msra.mxu0 %v44_v2  ;;  %v32_v13 = vadd.f32 %v31_v12, %v30_v11  ;;  %v42_v14 = vld [vmem:[%s263_s1] sm:$0xff]  ;;  %vm55_vm3 = vcmask 1041409   ;;  %vm129_vm4 = vcmask 25600   ;;  %s205_s28 = smov [#allocation2]  }
   0x6   :  { %167 = vmatprep.subr.mxu0 %v203_v1  ;;  %v24_v15 = vrot.slane %v23_v10, 4  ;;  %v156_v30 = vld [vmem:[%s264_s2] ss:$0 sm:$0xff]  ;;  %s148_s29 = sshll.u32 %s205_s28, 4  ;;  %s149_s29 = int_to_ptr.vmem [resolvable:$true] %s148_s29 }
   0x7   :  { %168 = vmatpush3.msra.mxu0 %v43_v9  ;;  %v33_v16 = vrot.slane %v32_v13, 4  ;;  %s181_s2 = scalar_lea.vmem %s149_s29, 32  ;;  %p186_p1 = scmp.lt.s32.totalorder %s149_s29, %s149_s29 }
   0x8   :  { %169 = vmatprep.subr.mxu0 %v203_v1  ;;  %v25_v17 = vadd.f32 %v24_v15, %v23_v10  ;;  %p182_p0 = scmp.ne.s32.totalorder %s149_s29, %s181_s2  ;;  %p187_p2 = scmp.lt.s32.totalorder %s181_s2, %s181_s2 }
   0x9   :  { %170 = vmatpush3.msra.mxu0 %v42_v14  ;;  %v34_v18 = vadd.f32 %v33_v16, %v32_v13 }
   0xa   :  { %v26_v19 = vrot.slane %v25_v17, 2  ;;  %p188_p3 = por %p187_p2, %p186_p1 }
   0xb   :  { %v35_v20 = vrot.slane %v34_v18, 2 }
   0xc   :  { %v27_v21 = vadd.f32 %v26_v19, %v25_v17  ;;  %p189_p4 = pnand %p188_p3, %p182_p0 }
   0xd   :  { %v36_v22 = vadd.f32 %v35_v20, %v34_v18 }
   0xe   :  { %v28_v23 = vrot.slane %v27_v21, 1 }
   0xf   :  { %v37_v24 = vrot.slane %v36_v22, 1 }
  0x10   :  { %v29_v25 = vadd.f32 %v28_v23, %v27_v21 }
  0x11   :  { %v38_v26 = vadd.f32 %v37_v24, %v36_v22 }
  0x12   :  { %v40_v27 = vmul.f32 0.11111111, %v29_v25 }
  0x13   :  { %v41_v28 = vmul.f32 0.11111111, %v38_v26 }
  0x15   :  { %v56_v29 = vsel %vm55_vm3, %v41_v28, %v40_v27 }
  0x16   :  { %172 = vmatmul.mubr.msk.f32.vlgmr.msra.gmra.mxu0 %vm19_vm0, %v56_v29 }
  0xd6   :  { %v125_v31 = vpop.f32.mrf.mxu0 }
  0xd7   :  { %v126_v32 = vadd.f32 %v156_v30, %v125_v31 }
  0xd8   :  { %v173_v33 = vpop.f32.mrf.mxu0 }
  0xd9   :  { %v130_v34 = vsel %vm129_vm4, %v126_v32, -inf }
  0xda   :  { %131 = vmax.xlane.f32.xlu0 %v130_v34 }
 0x163   :  { %v132_v35 = vpop.xlane.xlu0 %131 }
 0x164   :  { %v133_v36 = vsub.f32 %v126_v32, %v132_v35 }
 0x166   :  { %v134_v37 = vmul.f32 1.442695, %v133_v36 }
 0x168   :  { %177 = vpow2.f32 %v134_v37 }
 0x175   :  { %v178_v38 = vpop.eup %177 }
 0x176   :  { %v136_v39 = vsel %vm129_vm4, %v178_v38, 0.0 }
 0x177   :  { %137 = vadd.xlane.f32.xlu0 %v136_v39 }
 0x200   :  { %v138_v40 = vpop.xlane.xlu0 %137 }
 0x201   :  { %179 = vrcp.f32 %v138_v40 }
 0x20e   :  { %v180_v41 = vpop.eup %179 }
 0x20f   :  { %v140_v42 = vmul.f32 %v180_v41, %v178_v38 }
 0x211   :  { %141 = vst.msk [vmem:[#allocation2] sm:$0x3] %vm129_vm4, %v140_v42 }
 0x212   :  { %192 = shalt.err (!%p189_p4)
}
 0x213   :  { %151 = dma.vmem_to_hbm [thread:$0]  %s149_s29, 32, %s265_s3, [#allocation3]  }
 0x214   :  { %201 = dma.done.wait [#allocation3], 32  }
 0x215   :  { %202 = vsyncadd [#allocation3], 4294967264 }
 0x216   :  { %155 = vsyncpa [#allocation3], 1 }

// kernel: vit_forward.4
= control target key start
LH: loop header
LB: loop body
LE: loop exit
PB: predicated region body
PF: predicated region fallthrough
CT: control target
= control target key end

     0   :  { %vm19_vm0 = vcmask 261120   ;;  %v214_v0 = vmov 0   ;;  %v215_v2 = vmov 0.0   ;;  %vm122_vm1 = vcmask 523264   ;;  %s287_s1 = inlined_call_operand.vmem [shape: bf16[192,32], index: 1, kind: input, shape index: {}]   ;;  %s288_s0 = inlined_call_operand.vmem [shape: f32[8,192], index: 0, kind: input, shape index: {}]   ;;  %s289_s2 = inlined_call_operand.vmem [shape: f32[1,32], index: 2, kind: input, shape index: {}]   ;;  %s290_s3 = inlined_call_operand.vmem [shape: f32[8,32], index: 3, kind: output, shape index: {}]  }
   0x1   :  { %126 = vmatprep.subr.bf16.mxu0 %v214_v0  ;;  %v202_v1 = vld [vmem:[%s287_s1 + $0x38] sm:$0xff]   ;;  %20 = vst.msk [vmem:[#allocation2] sm:$0xff] %vm19_vm0, %v215_v2  ;;  %v203_v3 = vld [vmem:[%s287_s1 + $0x30] sm:$0xff]   ;;  %v204_v4 = vld [vmem:[%s287_s1 + $0x28] sm:$0xff]  }
   0x2   :  { %127 = vmatpush1.bf16.msra.mxu0 %v202_v1  ;;  %v205_v5 = vld [vmem:[%s287_s1 + $0x20] sm:$0xff]   ;;  %v23_v6 = vld [vmem:[%s288_s0 + $0x8] sm:$0xff]  ;;  %v206_v8 = vld [vmem:[%s287_s1 + $0x18] sm:$0xff]  }
   0x3   :  { %128 = vmatprep.subr.bf16.mxu0 %v214_v0  ;;  %v25_v7 = vpack.c.bf16 %v23_v6, %v23_v6  ;;  %v207_v9 = vld [vmem:[%s287_s1 + $0x10] sm:$0xff]   ;;  %v208_v10 = vld [vmem:[%s287_s1 + $0x8] sm:$0xff]   ;;  %v209_v11 = vld [vmem:[%s287_s1] sm:$0xff]  }
   0x4   :  { %v210_v12 = vld [vmem:[%s287_s1 + $0x58] sm:$0xff]   ;;  %v211_v13 = vld [vmem:[%s287_s1 + $0x50] sm:$0xff]   ;;  %v212_v14 = vld [vmem:[%s287_s1 + $0x48] sm:$0xff]  }
   0x5   :  { %198 = vmatprep.mubr.msk.bf16.mxu0 %vm122_vm1, %v25_v7  ;;  %v213_v15 = vld [vmem:[%s287_s1 + $0x40] sm:$0xff]  }
   0x6   :  { %129 = vmatpush1.bf16.msra.mxu0 %v203_v3  ;;  %v22_v16 = vld [vmem:[%s288_s0] sm:$0xff] }
   0x7   :  { %130 = vmatprep.subr.bf16.mxu0 %v214_v0  ;;  %v24_v17 = vpack.c.bf16 %v22_v16, %v22_v16  ;;  %v199_v24 = vld [vmem:[%s289_s2] ss:$0 sm:$0xff] }
   0x8   :  { %v21_v18 = vld [vmem:[#allocation2] sm:$0xff] }
   0xa   :  { %131 = vmatpush1.bf16.msra.mxu0 %v204_v4 }
   0xb   :  { %132 = vmatprep.subr.bf16.mxu0 %v214_v0 }
   0xe   :  { %133 = vmatpush1.bf16.msra.mxu0 %v205_v5 }
   0xf   :  { %134 = vmatprep.subr.bf16.mxu0 %v214_v0 }
  0x12   :  { %135 = vmatpush1.bf16.msra.mxu0 %v206_v8 }
  0x13   :  { %136 = vmatprep.subr.bf16.mxu0 %v214_v0 }
  0x16   :  { %137 = vmatpush1.bf16.msra.mxu0 %v207_v9 }
  0x17   :  { %138 = vmatprep.subr.bf16.mxu0 %v214_v0 }
  0x1a   :  { %139 = vmatpush1.bf16.msra.mxu0 %v208_v10 }
  0x1b   :  { %140 = vmatprep.subr.bf16.mxu0 %v214_v0 }
  0x1e   :  { %141 = vmatpush1.bf16.msra.mxu0 %v209_v11 }
  0x1f   :  { %150 = vmatprep.subr.bf16.mxu0 %v214_v0 }
  0x22   :  { %151 = vmatpush2.bf16.msra.mxu0 %v210_v12 }
  0x23   :  { %152 = vmatprep.subr.bf16.mxu0 %v214_v0 }
  0x26   :  { %153 = vmatpush2.bf16.msra.mxu0 %v211_v13 }
  0x27   :  { %154 = vmatprep.subr.bf16.mxu0 %v214_v0 }
  0x2a   :  { %155 = vmatpush2.bf16.msra.mxu0 %v212_v14 }
  0x2b   :  { %156 = vmatprep.subr.bf16.mxu0 %v214_v0 }
  0x2e   :  { %157 = vmatpush2.bf16.msra.mxu0 %v213_v15 }
  0x31   :  { %159 = vmatmul.mubr.bf16.vlgmr.msra.gmra.mxu0 %v24_v17 }
  0xf1   :  { %v160_v19 = vpop.f32.mrf.mxu0 }
  0xf2   :  { %v166_v20 = vadd.f32 %v160_v19, %v21_v18 }
  0xf3   :  { %v162_v21 = vpop.f32.mrf.mxu0 }
  0xf4   :  { %168 = vst.msk [vmem:[#allocation2] sm:$0xff] %vm19_vm0, %v166_v20 }
  0xf5   :  { %v163_v22 = vpop.f32.mrf.mxu0 }
  0xf7   :  { %v164_v23 = vpop.f32.mrf.mxu0 }
  0xfb   :  { %v172_v25 = vld [vmem:[#allocation2] sm:$0xff] }
  0xfc   :  { %v180_v26 = vadd.f32 %v199_v24, %v172_v25 }
  0xfe   :  { %181 = vst.msk [vmem:[%s290_s3] sm:$0xff] %vm19_vm0, %v180_v26 }

// kernel: vit_forward.5
= control target key start
LH: loop header
LB: loop body
LE: loop exit
PB: predicated region body
PF: predicated region fallthrough
CT: control target
= control target key end

     0   :  { %v1556_v0 = vmov 0.0   ;;  %vm1557_vm0 = vmmov 0   ;;  %vm87_vm1 = vcmask 261120   ;;  %s1558_s21 = smov 96   ;;  %s1560_s22 = smov 112   ;;  %vm192_vm2 = vcmask 64512   ;;  %s2017_s1 = inlined_call_operand.vmem [shape: bf16[32,96], index: 1, kind: input, shape index: {}]   ;;  %s2018_s0 = inlined_call_operand.vmem [shape: f32[2,9,32], index: 0, kind: input, shape index: {}]   ;;  %s2019_s2 = inlined_call_operand.vmem [shape: f32[1,96], index: 2, kind: input, shape index: {}]   ;;  %s2020_s3 = inlined_call_operand.vmem [shape: bf16[32,32], index: 3, kind: input, shape index: {}]   ;;  %s2021_s4 = inlined_call_operand.vmem [shape: f32[1,32], index: 4, kind: input, shape index: {}]   ;;  %s2022_s7 = inlined_call_operand.vmem [shape: bf16[32,64], index: 7, kind: input, shape index: {}]   ;;  %s2023_s9 = inlined_call_operand.vmem [shape: bf16[64,32], index: 9, kind: input, shape index: {}]   ;;  %s2024_s5 = inlined_call_operand.vmem [shape: f32[1,32], index: 5, kind: input, shape index: {}]   ;;  %s2025_s6 = inlined_call_operand.vmem [shape: f32[1,32], index: 6, kind: input, shape index: {}]   ;;  %s2026_s8 = inlined_call_operand.vmem [shape: f32[1,64], index: 8, kind: input, shape index: {}]   ;;  %s2027_s10 = inlined_call_operand.vmem [shape: f32[1,32], index: 10, kind: input, shape index: {}]   ;;  %s2028_s11 = inlined_call_operand.vmem [shape: f32[1,32], index: 11, kind: input, shape index: {}]   ;;  %s2029_s12 = inlined_call_operand.vmem [shape: f32[1,32], index: 12, kind: input, shape index: {}]   ;;  %s2030_s13 = inlined_call_operand.vmem [shape: f32[2,9,32], index: 13, kind: output, shape index: {}]  }
   0x1   :  { %1313 = vmatprep.subr.bf16.mxu1 %v1556_v0  ;;  %v1432_v1 = vld [vmem:[%s2017_s1 + $0x8] sm:$0xff]   ;;  %1317 = vmatprep.mubr.msk.bf16.mxu1 %vm1557_vm0, %v1556_v0  ;;  %v1433_v2 = vld [vmem:[%s2017_s1] sm:$0xff]   ;;  %v1252_v6 = vld [vmem:[%s2018_s0 + $0x10] sm:$0xff]  ;;  %s1561_s23 = smov 104   ;;  %vm196_vm3 = vcmask 57344   ;;  %s1562_s24 = smov 64  }
   0x2   :  { %1329 = vmatprep.subr.bf16.mxu0 %v1556_v0  ;;  %1333 = vmatprep.mubr.msk.bf16.mxu0 %vm1557_vm0, %v1556_v0  ;;  %v1648_v3 = vld [vmem:[%s2018_s0] sm:$0xff]  ;;  %v1653_v4 = vld [vmem:[%s2018_s0 + $0x8] sm:$0x1]  ;;  %v1253_v7 = vld [vmem:[%s2018_s0 + $0x18] sm:$0x1]  ;;  %vm438_vm4 = vcmask 130048  }
   0x3   :  { %1314 = vmatpush3.bf16.msra.mxu1 %v1432_v1  ;;  %v68_v5 = vpack.c.bf16 %v1653_v4, %v1648_v3  ;;  %v135_v8 = vpack.c.bf16 %v1253_v7, %v1252_v6  ;;  %v1248_v9 = vld [vmem:[%s2019_s2] ss:$0 sm:$0xff]  ;;  %s1559_s2 = smov 120   ;;  %vm441_vm5 = vcmask 195584   ;;  %vm513_vm6 = vcmask 253952  }
   0x4   :  { %1315 = vmatprep.subr.bf16.mxu1 %v1556_v0  ;;  %vm654_vm7 = vcmask 523264  }
   0x7   :  { %1316 = vmatpush3.bf16.msra.mxu1 %v1433_v2 }
   0x8   :  { %1321 = vmatprep.subr.bf16.mxu1 %v1556_v0 }
   0xa   :  { %1318 = vmatmul.mubr.msk.bf16.vlgmr.msra.gmra.mxu1 %vm87_vm1, %v68_v5 }
   0xb   :  { %1322 = vmatpush3.bf16.msra.mxu1 %v1432_v1  ;;  %1325 = vmatprep.mubr.msk.bf16.mxu1 %vm1557_vm0, %v1556_v0 }
   0xc   :  { %1323 = vmatprep.subr.bf16.mxu1 %v1556_v0 }
   0xf   :  { %1324 = vmatpush3.bf16.msra.mxu1 %v1433_v2 }
  0x10   :  { %1337 = vmatprep.subr.bf16.mxu1 %v1556_v0 }
  0x12   :  { %1326 = vmatmul.mubr.msk.bf16.vlgmr.msra.gmra.mxu1 %vm87_vm1, %v135_v8 }
  0x13   :  { %1341 = vmatprep.mubr.msk.bf16.mxu1 %vm1557_vm0, %v1556_v0 }
  0xca   :  { %v125_v10 = vpop.f32.mrf.mxu1 }
  0xcb   :  { %v1676_v11 = vadd.f32 %v1248_v9, %v125_v10 }
  0xcc   :  { %v1319_v12 = vpop.f32.mrf.mxu1 }
  0xcd   :  { %184 = vrot.lane.b32.xlu0 %v1676_v11, %s1558_s21  ;;  %v180_v22 = vmul.f32 0.35355338, %v1676_v11 }
  0xce   :  { %v128_v13 = vpop.f32.mrf.mxu1 }
  0xcf   :  { %v1679_v14 = vadd.f32 %v1248_v9, %v128_v13 }
  0xd0   :  { %v1320_v15 = vpop.f32.mrf.mxu1 }
  0xd1   :  { %186 = vrot.lane.b32.xlu0 %v1679_v14, %s1558_s21  ;;  %v181_v25 = vmul.f32 0.35355338, %v1679_v14 }
  0xd2   :  { %v173_v16 = vpop.f32.mrf.mxu1 }
  0xd3   :  { %v1682_v17 = vadd.f32 %v1248_v9, %v173_v16 }
  0xd4   :  { %v1327_v18 = vpop.f32.mrf.mxu1 }
  0xd5   :  { %202 = vrot.lane.b32.xlu1 %v1682_v17, %s1558_s21 }
  0xd6   :  { %v176_v19 = vpop.f32.mrf.mxu1 }
  0xd7   :  { %v1685_v20 = vadd.f32 %v1248_v9, %v176_v19 }
  0xd8   :  { %v1328_v21 = vpop.f32.mrf.mxu1 }
  0xd9   :  { %204 = vrot.lane.b32.xlu1 %v1685_v20, %s1558_s21 }
 0x13f   :  { %v1689_v23 = vpop.permute.xlu0 %184 }
 0x140   :  { %v190_v24 = vmul.f32 %v1689_v23, %v180_v22 }
 0x142   :  { %246 = vrot.lane.b32.xlu0 %v190_v24, %s1559_s2  ;;  %v193_v32 = vsel %vm192_vm2, %v190_v24, 0.0 }
 0x143   :  { %v1694_v26 = vpop.permute.xlu0 %186 }
 0x144   :  { %v191_v27 = vmul.f32 %v1694_v26, %v181_v25 }
 0x146   :  { %300 = vrot.lane.b32.xlu0 %v190_v24, %s1560_s22  ;;  %248 = vrot.lane.b32.xlu1 %v191_v27, %s1559_s2  ;;  %v197_v35 = vsel %vm196_vm3, %v191_v27, 0.0 }
 0x147   :  { %v1699_v28 = vpop.permute.xlu1 %202 }
 0x148   :  { %v208_v29 = vmul.f32 %v1699_v28, %v180_v22 }
 0x14a   :  { %352 = vrot.lane.b32.xlu0 %v190_v24, %s1561_s23  ;;  %302 = vrot.lane.b32.xlu1 %v191_v27, %s1560_s22  ;;  %v210_v33 = vsel %vm192_vm2, %v208_v29, 0.0 }
 0x14b   :  { %v1704_v30 = vpop.permute.xlu1 %204 }
 0x14c   :  { %v209_v31 = vmul.f32 %v1704_v30, %v181_v25 }
 0x14e   :  { %260 = vrot.lane.b32.xlu0 %v208_v29, %s1559_s2  ;;  %354 = vrot.lane.b32.xlu1 %v191_v27, %s1561_s23  ;;  %v213_v34 = vsel %vm196_vm3, %v209_v31, 0.0 }
 0x152   :  { %312 = vrot.lane.b32.xlu0 %v208_v29, %s1560_s22  ;;  %262 = vrot.lane.b32.xlu1 %v209_v31, %s1559_s2 }
 0x156   :  { %364 = vrot.lane.b32.xlu0 %v208_v29, %s1561_s23  ;;  %314 = vrot.lane.b32.xlu1 %v209_v31, %s1560_s22 }
 0x15a   :  { %366 = vrot.lane.b32.xlu1 %v209_v31, %s1561_s23 }
 0x175   :  { %194 = vadd.xlane.f32.xlu0 %v193_v32 }
 0x179   :  { %211 = vadd.xlane.f32.xlu0 %v210_v33 }
 0x17d   :  { %214 = vadd.xlane.f32.xlu0 %v213_v34 }
 0x17e   :  { %198 = vadd.xlane.f32.xlu1 %v197_v35 }
 0x1b4   :  { %v247_v36 = vpop.permute.xlu0 %246 }
 0x1b5   :  { %v252_v37 = vsel %vm192_vm2, %v247_v36, 0.0 }
 0x1b6   :  { %253 = vadd.xlane.f32.xlu1 %v252_v37 }
 0x1b8   :  { %v301_v38 = vpop.permute.xlu0 %300  ;;  %v249_v39 = vpop.permute.xlu1 %248 }
 0x1b9   :  { %v306_v40 = vsel %vm192_vm2, %v301_v38, 0.0  ;;  %v255_v41 = vsel %vm196_vm3, %v249_v39, 0.0 }
 0x1ba   :  { %307 = vadd.xlane.f32.xlu1 %v306_v40  ;;  %256 = vadd.xlane.f32.xlu0 %v255_v41 }
 0x1bc   :  { %v353_v42 = vpop.permute.xlu0 %352  ;;  %v303_v43 = vpop.permute.xlu1 %302 }
 0x1bd   :  { %v358_v44 = vsel %vm192_vm2, %v353_v42, 0.0  ;;  %v309_v45 = vsel %vm196_vm3, %v303_v43, 0.0 }
 0x1be   :  { %359 = vadd.xlane.f32.xlu1 %v358_v44  ;;  %310 = vadd.xlane.f32.xlu0 %v309_v45 }
 0x1c0   :  { %v261_v46 = vpop.permute.xlu0 %260  ;;  %v355_v47 = vpop.permute.xlu1 %354 }
 0x1c1   :  { %v266_v48 = vsel %vm192_vm2, %v261_v46, 0.0  ;;  %v361_v49 = vsel %vm196_vm3, %v355_v47, 0.0 }
 0x1c2   :  { %267 = vadd.xlane.f32.xlu1 %v266_v48  ;;  %362 = vadd.xlane.f32.xlu0 %v361_v49 }
 0x1c4   :  { %v313_v50 = vpop.permute.xlu0 %312  ;;  %v263_v51 = vpop.permute.xlu1 %262 }
 0x1c5   :  { %v318_v52 = vsel %vm192_vm2, %v313_v50, 0.0  ;;  %v269_v53 = vsel %vm196_vm3, %v263_v51, 0.0 }
 0x1c6   :  { %319 = vadd.xlane.f32.xlu1 %v318_v52  ;;  %270 = vadd.xlane.f32.xlu0 %v269_v53 }
 0x1c8   :  { %v365_v54 = vpop.permute.xlu0 %364  ;;  %v315_v55 = vpop.permute.xlu1 %314 }
 0x1c9   :  { %v370_v56 = vsel %vm192_vm2, %v365_v54, 0.0  ;;  %v321_v57 = vsel %vm196_vm3, %v315_v55, 0.0 }
 0x1ca   :  { %371 = vadd.xlane.f32.xlu1 %v370_v56  ;;  %322 = vadd.xlane.f32.xlu0 %v321_v57 }
 0x1cc   :  { %v367_v58 = vpop.permute.xlu1 %366 }
 0x1cd   :  { %v373_v59 = vsel %vm196_vm3, %v367_v58, 0.0 }
 0x1ce   :  { %374 = vadd.xlane.f32.xlu0 %v373_v59 }
 0x1fe   :  { %v195_v60 = vpop.xlane.xlu0 %194 }
 0x202   :  { %v212_v61 = vpop.xlane.xlu0 %211 }
 0x203   :  { %v216_v62 = vmax.f32 %v195_v60, %v212_v61 }
 0x205   :  { %v218_v63 = vsub.f32 %v195_v60, %v216_v62  ;;  %v224_v1 = vsub.f32 %v212_v61, %v216_v62 }
 0x206   :  { %v215_v2 = vpop.xlane.xlu0 %214 }
 0x207   :  { %v220_v5 = vmul.f32 1.442695, %v218_v63  ;;  %v226_v6 = vmul.f32 1.442695, %v224_v1  ;;  %v199_v7 = vpop.xlane.xlu1 %198 }
 0x208   :  { %v217_v8 = vmax.f32 %v199_v7, %v215_v2 }
 0x209   :  { %1442 = vpow2.f32 %v220_v5 }
 0x20a   :  { %1444 = vpow2.f32 %v226_v6  ;;  %v219_v9 = vsub.f32 %v199_v7, %v217_v8  ;;  %v225_v10 = vsub.f32 %v215_v2, %v217_v8 }
 0x20c   :  { %v222_v12 = vmul.f32 1.442695, %v219_v9  ;;  %v228_v13 = vmul.f32 1.442695, %v225_v10 }
 0x20e   :  { %1446 = vpow2.f32 %v222_v12 }
 0x20f   :  { %1448 = vpow2.f32 %v228_v13 }
 0x216   :  { %v1443_v15 = vpop.eup %1442 }
 0x217   :  { %v1445_v16 = vpop.eup %1444 }
 0x218   :  { %v230_v18 = vadd.f32 %v1445_v16, %v1443_v15 }
 0x21a   :  { %1450 = vrcp.f32 %v230_v18 }
 0x21b   :  { %v1447_v19 = vpop.eup %1446 }
 0x21c   :  { %v1449_v21 = vpop.eup %1448 }
 0x21d   :  { %v231_v22 = vadd.f32 %v1449_v21, %v1447_v19 }
 0x21f   :  { %1452 = vrcp.f32 %v231_v22 }
 0x227   :  { %v1451_v24 = vpop.eup %1450 }
 0x228   :  { %v234_v25 = vmul.f32 %v1451_v24, %v1443_v15  ;;  %v238_v27 = vmul.f32 %v1451_v24, %v1445_v16 }
 0x22a   :  { %v236_v32 = vmul.f32 %v234_v25, %v1676_v11  ;;  %v240_v34 = vmul.f32 %v238_v27, %v1682_v17 }
 0x22c   :  { %v1453_v29 = vpop.eup %1452  ;;  %v242_v37 = vadd.f32 %v240_v34, %v236_v32 }
 0x22d   :  { %v235_v31 = vmul.f32 %v1453_v29, %v1447_v19  ;;  %v239_v33 = vmul.f32 %v1453_v29, %v1449_v21 }
 0x22f   :  { %v237_v35 = vmul.f32 %v235_v31, %v1679_v14  ;;  %v241_v36 = vmul.f32 %v239_v33, %v1685_v20 }
 0x231   :  { %v243_v38 = vadd.f32 %v241_v36, %v237_v35 }
 0x233   :  { %v1392_v39 = vpack.i.bf16 %v243_v38, %v242_v37 }
 0x235   :  { %1393 = vrot.lane.b32.xlu1 %v1392_v39, %s1562_s24 }
 0x23f   :  { %v254_v40 = vpop.xlane.xlu1 %253 }
 0x243   :  { %v257_v41 = vpop.xlane.xlu0 %256  ;;  %v308_v42 = vpop.xlane.xlu1 %307 }
 0x247   :  { %v311_v43 = vpop.xlane.xlu0 %310  ;;  %v360_v44 = vpop.xlane.xlu1 %359 }
 0x24b   :  { %v363_v45 = vpop.xlane.xlu0 %362  ;;  %v268_v46 = vpop.xlane.xlu1 %267 }
 0x24c   :  { %v272_v47 = vmax.f32 %v254_v40, %v268_v46 }
 0x24e   :  { %v274_v48 = vsub.f32 %v254_v40, %v272_v47  ;;  %v280_v49 = vsub.f32 %v268_v46, %v272_v47 }
 0x24f   :  { %v271_v50 = vpop.xlane.xlu0 %270  ;;  %v320_v51 = vpop.xlane.xlu1 %319 }
 0x250   :  { %v276_v52 = vmul.f32 1.442695, %v274_v48  ;;  %v282_v53 = vmul.f32 1.442695, %v280_v49  ;;  %v273_v54 = vmax.f32 %v257_v41, %v271_v50  ;;  %v324_v55 = vmax.f32 %v308_v42, %v320_v51 }
 0x252   :  { %1454 = vpow2.f32 %v276_v52  ;;  %v275_v56 = vsub.f32 %v257_v41, %v273_v54  ;;  %v281_v57 = vsub.f32 %v271_v50, %v273_v54  ;;  %v326_v58 = vsub.f32 %v308_v42, %v324_v55 }
 0x253   :  { %1456 = vpow2.f32 %v282_v53  ;;  %v332_v59 = vsub.f32 %v320_v51, %v324_v55  ;;  %v323_v60 = vpop.xlane.xlu0 %322  ;;  %v372_v61 = vpop.xlane.xlu1 %371 }
 0x254   :  { %v278_v62 = vmul.f32 1.442695, %v275_v56  ;;  %v284_v63 = vmul.f32 1.442695, %v281_v57  ;;  %v328_v1 = vmul.f32 1.442695, %v326_v58  ;;  %v325_v2 = vmax.f32 %v311_v43, %v323_v60 }
 0x255   :  { %v334_v5 = vmul.f32 1.442695, %v332_v59  ;;  %v376_v6 = vmax.f32 %v360_v44, %v372_v61 }
 0x256   :  { %1458 = vpow2.f32 %v278_v62  ;;  %v327_v7 = vsub.f32 %v311_v43, %v325_v2  ;;  %v333_v8 = vsub.f32 %v323_v60, %v325_v2  ;;  %v1742_v60 = vld [vmem:[%s2020_s3 + $0x8] sm:$0xff]  }
 0x257   :  { %1460 = vpow2.f32 %v284_v63  ;;  %v378_v9 = vsub.f32 %v360_v44, %v376_v6  ;;  %v384_v10 = vsub.f32 %v372_v61, %v376_v6  ;;  %v375_v12 = vpop.xlane.xlu0 %374  ;;  %1330 = vmatpush3.bf16.msra.mxu0 %v1742_v60 }
 0x258   :  { %1462 = vpow2.f32 %v328_v1  ;;  %v330_v13 = vmul.f32 1.442695, %v327_v7  ;;  %v336_v15 = vmul.f32 1.442695, %v333_v8  ;;  %v377_v16 = vmax.f32 %v363_v45, %v375_v12  ;;  %1331 = vmatprep.subr.bf16.mxu0 %v1556_v0 }
 0x259   :  { %1464 = vpow2.f32 %v334_v5  ;;  %v380_v18 = vmul.f32 1.442695, %v378_v9  ;;  %v386_v19 = vmul.f32 1.442695, %v384_v10 }
 0x25a   :  { %1466 = vpow2.f32 %v330_v13  ;;  %v379_v21 = vsub.f32 %v363_v45, %v377_v16  ;;  %v385_v22 = vsub.f32 %v375_v12, %v377_v16  ;;  %v1753_v13 = vld [vmem:[%s2020_s3] sm:$0xff]   ;;  %v747_v16 = vmul.f32 0.35355338, %v1682_v17 }
 0x25b   :  { %1468 = vpow2.f32 %v336_v15  ;;  %1332 = vmatpush3.bf16.msra.mxu0 %v1753_v13 }
 0x25c   :  { %1470 = vpow2.f32 %v380_v18  ;;  %v382_v24 = vmul.f32 1.442695, %v379_v21  ;;  %v388_v25 = vmul.f32 1.442695, %v385_v22  ;;  %1345 = vmatprep.subr.bf16.mxu0 %v1556_v0 }
 0x25d   :  { %1472 = vpow2.f32 %v386_v19 }
 0x25e   :  { %1474 = vpow2.f32 %v382_v24 }
 0x25f   :  { %v1455_v27 = vpop.eup %1454  ;;  %1476 = vpow2.f32 %v388_v25 }
 0x260   :  { %v1457_v29 = vpop.eup %1456 }
 0x261   :  { %v286_v31 = vadd.f32 %v1457_v29, %v1455_v27 }
 0x263   :  { %v1459_v32 = vpop.eup %1458  ;;  %1478 = vrcp.f32 %v286_v31 }
 0x264   :  { %v1461_v33 = vpop.eup %1460 }
 0x265   :  { %v1463_v34 = vpop.eup %1462  ;;  %v287_v35 = vadd.f32 %v1461_v33, %v1459_v32 }
 0x266   :  { %v1465_v36 = vpop.eup %1464 }
 0x267   :  { %v1467_v37 = vpop.eup %1466  ;;  %1480 = vrcp.f32 %v287_v35  ;;  %v338_v38 = vadd.f32 %v1465_v36, %v1463_v34 }
 0x268   :  { %v1469_v39 = vpop.eup %1468 }
 0x269   :  { %v1471_v40 = vpop.eup %1470  ;;  %1482 = vrcp.f32 %v338_v38  ;;  %v339_v41 = vadd.f32 %v1469_v39, %v1467_v37  ;;  %v748_v38 = vmul.f32 0.35355338, %v1685_v20 }
 0x26a   :  { %v1473_v42 = vpop.eup %1472 }
 0x26b   :  { %v1475_v43 = vpop.eup %1474  ;;  %1484 = vrcp.f32 %v339_v41  ;;  %v390_v44 = vadd.f32 %v1473_v42, %v1471_v40 }
 0x26c   :  { %v1477_v45 = vpop.eup %1476 }
 0x26d   :  { %1486 = vrcp.f32 %v390_v44  ;;  %v391_v46 = vadd.f32 %v1477_v45, %v1475_v43 }
 0x26f   :  { %1488 = vrcp.f32 %v391_v46 }
 0x270   :  { %v1479_v47 = vpop.eup %1478 }
 0x271   :  { %v290_v48 = vmul.f32 %v1479_v47, %v1455_v27  ;;  %v294_v49 = vmul.f32 %v1479_v47, %v1457_v29  ;;  %v749_v29 = vmul.f32 %v747_v16, %v1689_v23  ;;  %v750_v23 = vmul.f32 %v748_v38, %v1694_v26 }
 0x273   :  { %v292_v51 = vmul.f32 %v290_v48, %v1676_v11  ;;  %v296_v52 = vmul.f32 %v294_v49, %v1682_v17  ;;  %v751_v26 = vsel %vm192_vm2, %v749_v29, 0.0 }
 0x274   :  { %v1481_v50 = vpop.eup %1480 }
 0x275   :  { %v291_v53 = vmul.f32 %v1481_v50, %v1459_v32  ;;  %v295_v54 = vmul.f32 %v1481_v50, %v1461_v33  ;;  %v298_v62 = vadd.f32 %v296_v52, %v292_v51 }
 0x276   :  { %v1483_v55 = vpop.eup %1482 }
 0x277   :  { %v293_v56 = vmul.f32 %v291_v53, %v1679_v14  ;;  %v297_v57 = vmul.f32 %v295_v54, %v1685_v20  ;;  %v342_v58 = vmul.f32 %v1483_v55, %v1463_v34  ;;  %v346_v59 = vmul.f32 %v1483_v55, %v1465_v36 }
 0x278   :  { %v1485_v61 = vpop.eup %1484  ;;  %v757_v36 = vmul.f32 %v747_v16, %v1699_v28  ;;  %v754_v28 = vsel %vm196_vm3, %v750_v23, 0.0 }
 0x279   :  { %v299_v63 = vadd.f32 %v297_v57, %v293_v56  ;;  %v343_v1 = vmul.f32 %v1485_v61, %v1467_v37  ;;  %v344_v2 = vmul.f32 %v342_v58, %v1676_v11  ;;  %v347_v5 = vmul.f32 %v1485_v61, %v1469_v39 }
 0x27a   :  { %v1487_v6 = vpop.eup %1486  ;;  %v348_v7 = vmul.f32 %v346_v59, %v1682_v17  ;;  %v758_v39 = vmul.f32 %v748_v38, %v1704_v30 }
 0x27b   :  { %v1397_v8 = vpack.i.bf16 %v299_v63, %v298_v62  ;;  %v345_v9 = vmul.f32 %v343_v1, %v1679_v14  ;;  %v349_v10 = vmul.f32 %v347_v5, %v1685_v20  ;;  %v394_v12 = vmul.f32 %v1487_v6, %v1471_v40 }
 0x27c   :  { %v1489_v15 = vpop.eup %1488  ;;  %v350_v18 = vadd.f32 %v348_v7, %v344_v2  ;;  %v398_v19 = vmul.f32 %v1487_v6, %v1473_v42  ;;  %v762_v30 = vsel %vm196_vm3, %v758_v39, 0.0  ;;  %v759_v40 = vsel %vm192_vm2, %v757_v36, 0.0 }
 0x27d   :  { %1398 = vrot.lane.b32.xlu0 %v1397_v8, %s1562_s24  ;;  %v351_v21 = vadd.f32 %v349_v10, %v345_v9  ;;  %v395_v22 = vmul.f32 %v1489_v15, %v1475_v43  ;;  %v396_v24 = vmul.f32 %v394_v12, %v1676_v11  ;;  %v399_v25 = vmul.f32 %v1489_v15, %v1477_v45 }
 0x27e   :  { %v400_v27 = vmul.f32 %v398_v19, %v1682_v17 }
 0x27f   :  { %v1402_v31 = vpack.i.bf16 %v351_v21, %v350_v18  ;;  %v397_v32 = vmul.f32 %v395_v22, %v1679_v14  ;;  %v401_v33 = vmul.f32 %v399_v25, %v1685_v20  ;;  %v1806_v21 = vld [vmem:[%s2021_s4] ss:$0 sm:$0xff] }
 0x280   :  { %v402_v34 = vadd.f32 %v400_v27, %v396_v24 }
 0x281   :  { %795 = vrot.lane.b32.xlu0 %v749_v29, %s1559_s2  ;;  %1403 = vrot.lane.b32.xlu1 %v1402_v31, %s1562_s24  ;;  %v403_v35 = vadd.f32 %v401_v33, %v397_v32 }
 0x283   :  { %v1407_v37 = vpack.i.bf16 %v403_v35, %v402_v34 }
 0x285   :  { %809 = vrot.lane.b32.xlu0 %v757_v36, %s1559_s2  ;;  %1408 = vrot.lane.b32.xlu1 %v1407_v37, %s1562_s24 }
 0x289   :  { %849 = vrot.lane.b32.xlu0 %v749_v29, %s1560_s22  ;;  %797 = vrot.lane.b32.xlu1 %v750_v23, %s1559_s2 }
 0x28d   :  { %861 = vrot.lane.b32.xlu0 %v757_v36, %s1560_s22  ;;  %811 = vrot.lane.b32.xlu1 %v758_v39, %s1559_s2 }
 0x291   :  { %901 = vrot.lane.b32.xlu0 %v749_v29, %s1561_s23  ;;  %851 = vrot.lane.b32.xlu1 %v750_v23, %s1560_s22 }
 0x295   :  { %913 = vrot.lane.b32.xlu0 %v757_v36, %s1561_s23  ;;  %863 = vrot.lane.b32.xlu1 %v758_v39, %s1560_s22 }
 0x299   :  { %903 = vrot.lane.b32.xlu1 %v750_v23, %s1561_s23 }
 0x29d   :  { %915 = vrot.lane.b32.xlu1 %v758_v39, %s1561_s23 }
 0x2a7   :  { %v1394_v41 = vpop.permute.xlu1 %1393 }
 0x2a8   :  { %v1395_v48 = vunpack.i.l.bf16 %v1394_v41  ;;  %v1396_v51 = vunpack.i.h.bf16 %v1394_v41 }
 0x2b4   :  { %752 = vadd.xlane.f32.xlu0 %v751_v26 }
 0x2b8   :  { %755 = vadd.xlane.f32.xlu0 %v754_v28 }
 0x2bc   :  { %763 = vadd.xlane.f32.xlu0 %v762_v30 }
 0x2c1   :  { %760 = vadd.xlane.f32.xlu1 %v759_v40 }
 0x2ef   :  { %v1399_v42 = vpop.permute.xlu0 %1398 }
 0x2f0   :  { %v1400_v43 = vunpack.i.l.bf16 %v1399_v42  ;;  %v1401_v46 = vunpack.i.h.bf16 %v1399_v42 }
 0x2f2   :  { %v436_v52 = vsel %vm192_vm2, %v1395_v48, %v1400_v43  ;;  %v437_v55 = vsel %vm192_vm2, %v1396_v51, %v1401_v46 }
 0x2f3   :  { %v796_v44 = vpop.permute.xlu0 %795  ;;  %v1404_v45 = vpop.permute.xlu1 %1403 }
 0x2f4   :  { %v801_v47 = vsel %vm192_vm2, %v796_v44, 0.0  ;;  %v1406_v49 = vunpack.i.h.bf16 %v1404_v45  ;;  %v1405_v50 = vunpack.i.l.bf16 %v1404_v45 }
 0x2f5   :  { %802 = vadd.xlane.f32.xlu1 %v801_v47 }
 0x2f6   :  { %v439_v59 = vsel %vm438_vm4, %v436_v52, %v1405_v50  ;;  %v440_v61 = vsel %vm438_vm4, %v437_v55, %v1406_v49 }
 0x2f7   :  { %v810_v53 = vpop.permute.xlu0 %809  ;;  %v1409_v54 = vpop.permute.xlu1 %1408 }
 0x2f8   :  { %v1411_v56 = vunpack.i.h.bf16 %v1409_v54  ;;  %v1410_v57 = vunpack.i.l.bf16 %v1409_v54  ;;  %v815_v58 = vsel %vm192_vm2, %v810_v53, 0.0 }
 0x2f9   :  { %816 = vadd.xlane.f32.xlu1 %v815_v58 }
 0x2fa   :  { %v442_v62 = vsel %vm441_vm5, %v439_v59, %v1410_v57  ;;  %v443_v63 = vsel %vm441_vm5, %v440_v61, %v1411_v56 }
 0x2fb   :  { %v444_v1 = vpack.c.bf16 %v443_v63, %v442_v62  ;;  %v850_v2 = vpop.permute.xlu0 %849  ;;  %v798_v5 = vpop.permute.xlu1 %797 }
 0x2fc   :  { %v855_v6 = vsel %vm192_vm2, %v850_v2, 0.0  ;;  %v804_v7 = vsel %vm196_vm3, %v798_v5, 0.0 }
 0x2fd   :  { %1334 = vmatmul.mubr.msk.bf16.vlgmr.msra.gmra.mxu0 %vm87_vm1, %v444_v1  ;;  %856 = vadd.xlane.f32.xlu1 %v855_v6 }
 0x2fe   :  { %805 = vadd.xlane.f32.xlu0 %v804_v7  ;;  %1353 = vmatprep.mubr.msk.bf16.mxu0 %vm1557_vm0, %v1556_v0 }
 0x2ff   :  { %v862_v8 = vpop.permute.xlu0 %861  ;;  %v812_v9 = vpop.permute.xlu1 %811 }
 0x300   :  { %v867_v10 = vsel %vm192_vm2, %v862_v8, 0.0  ;;  %v818_v12 = vsel %vm196_vm3, %v812_v9, 0.0 }
 0x301   :  { %868 = vadd.xlane.f32.xlu1 %v867_v10 }
 0x302   :  { %819 = vadd.xlane.f32.xlu0 %v818_v12 }
 0x303   :  { %v852_v15 = vpop.permute.xlu1 %851  ;;  %v902_v36 = vpop.permute.xlu0 %901 }
 0x304   :  { %v858_v16 = vsel %vm196_vm3, %v852_v15, 0.0  ;;  %v907_v23 = vsel %vm192_vm2, %v902_v36, 0.0 }
 0x306   :  { %859 = vadd.xlane.f32.xlu0 %v858_v16 }
 0x307   :  { %v864_v18 = vpop.permute.xlu1 %863  ;;  %v914_v26 = vpop.permute.xlu0 %913 }
 0x308   :  { %v870_v19 = vsel %vm196_vm3, %v864_v18, 0.0  ;;  %v919_v28 = vsel %vm192_vm2, %v914_v26, 0.0 }
 0x30a   :  { %871 = vadd.xlane.f32.xlu0 %v870_v19 }
 0x30b   :  { %v904_v29 = vpop.permute.xlu1 %903 }
 0x30f   :  { %v916_v38 = vpop.permute.xlu1 %915 }
 0x310   :  { %v922_v39 = vsel %vm196_vm3, %v916_v38, 0.0 }
 0x34a   :  { %v761_v41 = vpop.xlane.xlu1 %760 }
 0x37e   :  { %v803_v43 = vpop.xlane.xlu1 %802 }
 0x382   :  { %v817_v45 = vpop.xlane.xlu1 %816 }
 0x383   :  { %v821_v6 = vmax.f32 %v803_v43, %v817_v45 }
 0x385   :  { %v823_v16 = vsub.f32 %v803_v43, %v821_v6  ;;  %v829_v19 = vsub.f32 %v817_v45, %v821_v6 }
 0x386   :  { %v857_v47 = vpop.xlane.xlu1 %856 }
 0x38a   :  { %v869_v52 = vpop.xlane.xlu1 %868 }
 0x38b   :  { %v873_v57 = vmax.f32 %v857_v47, %v869_v52 }
 0x38d   :  { %v875_v5 = vsub.f32 %v857_v47, %v873_v57  ;;  %v881_v7 = vsub.f32 %v869_v52, %v873_v57 }
 0x38f   :  { %v877_v12 = vmul.f32 1.442695, %v875_v5  ;;  %v883_v18 = vmul.f32 1.442695, %v881_v7 }
 0x3bd   :  { %v501_v22 = vpop.f32.mrf.mxu0 }
 0x3be   :  { %v502_v24 = vadd.f32 %v1806_v21, %v501_v22 }
 0x3bf   :  { %v1335_v25 = vpop.f32.mrf.mxu0 }
 0x3c0   :  { %v1810_v27 = vadd.f32 %v502_v24, %v1648_v3  ;;  %v910_v3 = vsel %vm196_vm3, %v904_v29, 0.0  ;;  %v825_v25 = vmul.f32 1.442695, %v823_v16  ;;  %v831_v29 = vmul.f32 1.442695, %v829_v19 }
 0x3c1   :  { %v504_v31 = vpop.f32.mrf.mxu0 }
 0x3c2   :  { %v505_v32 = vadd.f32 %v1806_v21, %v504_v31  ;;  %v510_v33 = vsel %vm87_vm1, %v1810_v27, 0.0 }
 0x3c3   :  { %v1336_v34 = vpop.f32.mrf.mxu0  ;;  %511 = vadd.xlane.f32.xlu0 %v510_v33 }
 0x3c4   :  { %v1816_v35 = vadd.f32 %v505_v32, %v1653_v4  ;;  %v753_v4 = vpop.xlane.xlu0 %752 }
 0x3c5   :  { %v765_v48 = vmax.f32 %v753_v4, %v761_v41 }
 0x3c6   :  { %v514_v37 = vsel %vm513_vm6, %v1816_v35, 0.0 }
 0x3c7   :  { %515 = vadd.xlane.f32.xlu1 %v514_v37  ;;  %911 = vadd.xlane.f32.xlu0 %v910_v3  ;;  %v767_v51 = vsub.f32 %v753_v4, %v765_v48  ;;  %v773_v54 = vsub.f32 %v761_v41, %v765_v48 }
 0x3c8   :  { %v756_v30 = vpop.xlane.xlu0 %755 }
 0x3c9   :  { %v769_v58 = vmul.f32 1.442695, %v767_v51  ;;  %v775_v61 = vmul.f32 1.442695, %v773_v54 }
 0x3cb   :  { %908 = vadd.xlane.f32.xlu1 %v907_v23  ;;  %923 = vadd.xlane.f32.xlu0 %v922_v39  ;;  %1490 = vpow2.f32 %v769_v58 }
 0x3cc   :  { %v764_v40 = vpop.xlane.xlu0 %763  ;;  %1492 = vpow2.f32 %v775_v61 }
 0x3cd   :  { %v766_v50 = vmax.f32 %v756_v30, %v764_v40 }
 0x3cf   :  { %920 = vadd.xlane.f32.xlu1 %v919_v28  ;;  %v768_v55 = vsub.f32 %v756_v30, %v766_v50  ;;  %v774_v56 = vsub.f32 %v764_v40, %v766_v50 }
 0x3d0   :  { %v806_v42 = vpop.xlane.xlu0 %805 }
 0x3d1   :  { %v771_v63 = vmul.f32 1.442695, %v768_v55  ;;  %v777_v2 = vmul.f32 1.442695, %v774_v56 }
 0x3d3   :  { %1494 = vpow2.f32 %v771_v63 }
 0x3d4   :  { %v820_v44 = vpop.xlane.xlu0 %819  ;;  %1496 = vpow2.f32 %v777_v2 }
 0x3d5   :  { %v822_v1 = vmax.f32 %v806_v42, %v820_v44 }
 0x3d7   :  { %v824_v10 = vsub.f32 %v806_v42, %v822_v1  ;;  %v830_v15 = vsub.f32 %v820_v44, %v822_v1 }
 0x3d8   :  { %v860_v46 = vpop.xlane.xlu0 %859  ;;  %v1491_v31 = vpop.eup %1490 }
 0x3d9   :  { %v827_v22 = vmul.f32 1.442695, %v824_v10  ;;  %v833_v24 = vmul.f32 1.442695, %v830_v15  ;;  %v1493_v32 = vpop.eup %1492 }
 0x3da   :  { %v779_v37 = vadd.f32 %v1493_v32, %v1491_v31 }
 0x3dc   :  { %v872_v49 = vpop.xlane.xlu0 %871 }
 0x3dd   :  { %v874_v53 = vmax.f32 %v860_v46, %v872_v49 }
 0x3df   :  { %v876_v59 = vsub.f32 %v860_v46, %v874_v53  ;;  %v882_v62 = vsub.f32 %v872_v49, %v874_v53 }
 0x3e0   :  { %v1495_v33 = vpop.eup %1494 }
 0x3e1   :  { %v879_v8 = vmul.f32 1.442695, %v876_v59  ;;  %v885_v9 = vmul.f32 1.442695, %v882_v62  ;;  %v1497_v34 = vpop.eup %1496 }
 0x3e2   :  { %v780_v38 = vadd.f32 %v1497_v34, %v1495_v33 }
 0x3e3   :  { %1498 = vpow2.f32 %v879_v8 }
 0x3e4   :  { %1500 = vpow2.f32 %v885_v9 }
 0x3e5   :  { %1502 = vpow2.f32 %v877_v12 }
 0x3e6   :  { %1504 = vpow2.f32 %v883_v18 }
 0x3e7   :  { %1506 = vpow2.f32 %v827_v22 }
 0x3e8   :  { %1508 = vpow2.f32 %v833_v24 }
 0x3e9   :  { %1510 = vpow2.f32 %v825_v25 }
 0x3ea   :  { %1512 = vpow2.f32 %v831_v29 }
 0x3eb   :  { %1514 = vrcp.f32 %v779_v37 }
 0x3ec   :  { %1516 = vrcp.f32 %v780_v38 }
 0x3f0   :  { %v1499_v36 = vpop.eup %1498 }
 0x3f1   :  { %v1501_v3 = vpop.eup %1500 }
 0x3f2   :  { %v1503_v23 = vpop.eup %1502  ;;  %v888_v26 = vadd.f32 %v1501_v3, %v1499_v36 }
 0x3f3   :  { %v1505_v39 = vpop.eup %1504 }
 0x3f4   :  { %v1824_v28 = vpop.eup %1506  ;;  %v887_v30 = vadd.f32 %v1505_v39, %v1503_v23  ;;  %1518 = vrcp.f32 %v888_v26 }
 0x3f5   :  { %v1509_v4 = vpop.eup %1508 }
 0x3f6   :  { %v1826_v40 = vpop.eup %1510  ;;  %v836_v42 = vadd.f32 %v1509_v4, %v1824_v28  ;;  %1520 = vrcp.f32 %v887_v30 }
 0x3f7   :  { %v1828_v41 = vpop.eup %1512 }
 0x3f8   :  { %v835_v45 = vadd.f32 %v1828_v41, %v1826_v40  ;;  %1522 = vrcp.f32 %v836_v42  ;;  %v1515_v51 = vpop.eup %1514 }
 0x3f9   :  { %v1517_v56 = vpop.eup %1516  ;;  %v783_v58 = vmul.f32 %v1515_v51, %v1491_v31  ;;  %v787_v59 = vmul.f32 %v1515_v51, %v1493_v32 }
 0x3fa   :  { %1524 = vrcp.f32 %v835_v45  ;;  %v788_v5 = vmul.f32 %v1517_v56, %v1497_v34 }
 0x3fb   :  { %v785_v10 = vmul.f32 %v783_v58, %v1676_v11  ;;  %v789_v12 = vmul.f32 %v787_v59, %v1682_v17  ;;  %v1866_v58 = vld [vmem:[%s2022_s7 + $0x8] sm:$0xff]  }
 0x3fc   :  { %v790_v24 = vmul.f32 %v788_v5, %v1685_v20  ;;  %1338 = vmatpush3.bf16.msra.mxu1 %v1866_v58 }
 0x3fd   :  { %v791_v37 = vadd.f32 %v789_v12, %v785_v10  ;;  %1339 = vmatprep.subr.bf16.mxu1 %v1556_v0 }
 0x401   :  { %v1519_v61 = vpop.eup %1518 }
 0x402   :  { %v892_v15 = vmul.f32 %v1519_v61, %v1499_v36  ;;  %v896_v19 = vmul.f32 %v1519_v61, %v1501_v3 }
 0x403   :  { %v1521_v9 = vpop.eup %1520 }
 0x404   :  { %v891_v32 = vmul.f32 %v1521_v9, %v1503_v23  ;;  %v894_v38 = vmul.f32 %v892_v15, %v1679_v14  ;;  %v898_v36 = vmul.f32 %v896_v19, %v1685_v20  ;;  %v1884_v15 = vld [vmem:[%s2023_s9 + $0x18] sm:$0xff]  }
 0x405   :  { %v1523_v25 = vpop.eup %1522  ;;  %1346 = vmatpush3.bf16.msra.mxu0 %v1884_v15 }
 0x406   :  { %v840_v3 = vmul.f32 %v1523_v25, %v1824_v28  ;;  %v844_v26 = vmul.f32 %v1523_v25, %v1509_v4  ;;  %v893_v42 = vmul.f32 %v891_v32, %v1676_v11  ;;  %v900_v45 = vadd.f32 %v898_v36, %v894_v38  ;;  %1347 = vmatprep.subr.bf16.mxu0 %v1556_v0  ;;  %v1893_v25 = vld [vmem:[%s2024_s5] ss:$0 sm:$0xff] }
 0x407   :  { %v1525_v34 = vpop.eup %1524 }
 0x408   :  { %v843_v23 = vmul.f32 %v1525_v34, %v1828_v41 }
 0x40a   :  { %v845_v4 = vmul.f32 %v843_v23, %v1682_v17 }
 0x44c   :  { %v512_v43 = vpop.xlane.xlu0 %511 }
 0x44d   :  { %v518_v44 = vmul.f32 0.03125, %v512_v43 }
 0x44f   :  { %v1834_v46 = vsub.f32 %v1810_v27, %v518_v44  ;;  %v839_v44 = vmul.f32 %v1525_v34, %v1826_v40 }
 0x450   :  { %v516_v47 = vpop.xlane.xlu1 %515  ;;  %v912_v48 = vpop.xlane.xlu0 %911 }
 0x451   :  { %v519_v49 = vmul.f32 0.03125, %v516_v47  ;;  %v522_v50 = vmul.f32 %v1834_v46, %v1834_v46  ;;  %v842_v47 = vmul.f32 %v840_v3, %v1679_v14  ;;  %v841_v28 = vmul.f32 %v839_v44, %v1676_v11 }
 0x453   :  { %v1839_v52 = vsub.f32 %v1816_v35, %v519_v49  ;;  %v524_v53 = vsel %vm87_vm1, %v522_v50, 0.0  ;;  %v784_v35 = vmul.f32 %v1517_v56, %v1495_v33  ;;  %v895_v33 = vmul.f32 %v1521_v9, %v1505_v39 }
 0x454   :  { %v909_v54 = vpop.xlane.xlu1 %908  ;;  %525 = vadd.xlane.f32.xlu1 %v524_v53  ;;  %v924_v55 = vpop.xlane.xlu0 %923  ;;  %v847_v41 = vadd.f32 %v845_v4, %v841_v28 }
 0x455   :  { %v926_v27 = vmax.f32 %v912_v48, %v924_v55  ;;  %v523_v57 = vmul.f32 %v1839_v52, %v1839_v52  ;;  %v786_v22 = vmul.f32 %v784_v35, %v1679_v14  ;;  %v897_v43 = vmul.f32 %v895_v33, %v1682_v17 }
 0x457   :  { %v928_v62 = vsub.f32 %v912_v48, %v926_v27  ;;  %v934_v63 = vsub.f32 %v924_v55, %v926_v27  ;;  %v527_v1 = vsel %vm513_vm6, %v523_v57, 0.0  ;;  %v792_v30 = vadd.f32 %v790_v24, %v786_v22 }
 0x458   :  { %v921_v2 = vpop.xlane.xlu1 %920  ;;  %528 = vadd.xlane.f32.xlu0 %v527_v1  ;;  %v846_v48 = vmul.f32 %v844_v26, %v1685_v20  ;;  %v899_v49 = vadd.f32 %v897_v43, %v893_v42 }
 0x459   :  { %v931_v6 = vmul.f32 1.442695, %v928_v62  ;;  %v937_v7 = vmul.f32 1.442695, %v934_v63  ;;  %v925_v8 = vmax.f32 %v909_v54, %v921_v2  ;;  %v1412_v39 = vpack.i.bf16 %v792_v30, %v791_v37  ;;  %v1873_v63 = vld [vmem:[%s2022_s7] sm:$0xff]  }
 0x45a   :  { %v1422_v50 = vpack.i.bf16 %v900_v45, %v899_v49  ;;  %v848_v53 = vadd.f32 %v846_v48, %v842_v47  ;;  %1340 = vmatpush3.bf16.msra.mxu1 %v1873_v63  ;;  %v1900_v37 = vld [vmem:[%s2025_s6] ss:$0 sm:$0xff] }
 0x45b   :  { %1526 = vpow2.f32 %v931_v6  ;;  %v927_v16 = vsub.f32 %v909_v54, %v925_v8  ;;  %v933_v18 = vsub.f32 %v921_v2, %v925_v8  ;;  %1357 = vmatprep.subr.bf16.mxu1 %v1556_v0 }
 0x45c   :  { %1528 = vpow2.f32 %v937_v7  ;;  %v1417_v56 = vpack.i.bf16 %v848_v53, %v847_v41  ;;  %v1441_v53 = vld [vmem:[%s2023_s9] sm:$0xff]  }
 0x45d   :  { %v929_v29 = vmul.f32 1.442695, %v927_v16  ;;  %v935_v31 = vmul.f32 1.442695, %v933_v18 }
 0x45f   :  { %1530 = vpow2.f32 %v929_v29 }
 0x460   :  { %1532 = vpow2.f32 %v935_v31 }
 0x465   :  { %1413 = vrot.lane.b32.xlu1 %v1412_v39, %s1562_s24 }
 0x468   :  { %v1527_v51 = vpop.eup %1526 }
 0x469   :  { %v1529_v54 = vpop.eup %1528  ;;  %1423 = vrot.lane.b32.xlu1 %v1422_v50, %s1562_s24 }
 0x46a   :  { %v940_v40 = vadd.f32 %v1529_v54, %v1527_v51 }
 0x46c   :  { %v1531_v55 = vpop.eup %1530  ;;  %1534 = vrcp.f32 %v940_v40 }
 0x46d   :  { %v1533_v27 = vpop.eup %1532 }
 0x46e   :  { %v939_v57 = vadd.f32 %v1533_v27, %v1531_v55  ;;  %1418 = vrot.lane.b32.xlu0 %v1417_v56, %s1562_s24 }
 0x470   :  { %1536 = vrcp.f32 %v939_v57 }
 0x479   :  { %v1535_v59 = vpop.eup %1534 }
 0x47a   :  { %v944_v61 = vmul.f32 %v1535_v59, %v1527_v51  ;;  %v948_v62 = vmul.f32 %v1535_v59, %v1529_v54  ;;  %v1945_v54 = vld [vmem:[%s2026_s8] ss:$0 sm:$0xff] }
 0x47c   :  { %v946_v35 = vmul.f32 %v944_v61, %v1679_v14  ;;  %v950_v6 = vmul.f32 %v948_v62, %v1685_v20 }
 0x47d   :  { %v1537_v1 = vpop.eup %1536 }
 0x47e   :  { %v943_v2 = vmul.f32 %v1537_v1, %v1531_v55  ;;  %v947_v5 = vmul.f32 %v1537_v1, %v1533_v27  ;;  %v952_v10 = vadd.f32 %v950_v6, %v946_v35 }
 0x480   :  { %v945_v7 = vmul.f32 %v943_v2, %v1676_v11  ;;  %v949_v8 = vmul.f32 %v947_v5, %v1682_v17  ;;  %v1554_v2 = vld [vmem:[%s2018_s0 + $0x10] sm:$0xff] }
 0x482   :  { %v951_v9 = vadd.f32 %v949_v8, %v945_v7 }
 0x484   :  { %v1427_v12 = vpack.i.bf16 %v952_v10, %v951_v9  ;;  %v1555_v9 = vld [vmem:[%s2018_s0 + $0x18] sm:$0x1] }
 0x486   :  { %1428 = vrot.lane.b32.xlu1 %v1427_v12, %s1562_s24 }
 0x4dd   :  { %v526_v14 = vpop.xlane.xlu1 %525 }
 0x4de   :  { %v530_v20 = vmul.f32 0.03125, %v526_v14 }
 0x4e0   :  { %v532_v16 = vadd.f32 1e-05, %v530_v20 }
 0x4e1   :  { %v529_v11 = vpop.xlane.xlu0 %528  ;;  %v1414_v19 = vpop.permute.xlu1 %1413 }
 0x4e2   :  { %1538 = vrsqrt.f32 %v532_v16  ;;  %v531_v17 = vmul.f32 0.03125, %v529_v11  ;;  %v1415_v42 = vunpack.i.l.bf16 %v1414_v19 }
 0x4e4   :  { %v533_v18 = vadd.f32 1e-05, %v531_v17 }
 0x4e5   :  { %v1424_v32 = vpop.permute.xlu1 %1423  ;;  %v1419_v33 = vpop.permute.xlu0 %1418 }
 0x4e6   :  { %1540 = vrsqrt.f32 %v533_v18  ;;  %v1420_v36 = vunpack.i.l.bf16 %v1419_v33  ;;  %v1426_v43 = vunpack.i.h.bf16 %v1424_v32  ;;  %v1425_v44 = vunpack.i.l.bf16 %v1424_v32 }
 0x4e8   :  { %v985_v45 = vsel %vm192_vm2, %v1415_v42, %v1420_v36 }
 0x4e9   :  { %v987_v49 = vsel %vm438_vm4, %v985_v45, %v1425_v44 }
 0x4ef   :  { %v1539_v22 = vpop.eup %1538 }
 0x4f0   :  { %v536_v24 = vmul.f32 %v1539_v22, %v1834_v46  ;;  %v1421_v46 = vunpack.i.h.bf16 %v1419_v33 }
 0x4f2   :  { %v545_v34 = vmul.f32 %v1893_v25, %v536_v24  ;;  %v1971_v24 = vld [vmem:[%s2027_s10] ss:$0 sm:$0xff] }
 0x4f3   :  { %v1541_v29 = vpop.eup %1540 }
 0x4f4   :  { %v537_v31 = vmul.f32 %v1541_v29, %v1839_v52  ;;  %v1904_v26 = vadd.f32 %v1900_v37, %v545_v34  ;;  %v1416_v52 = vunpack.i.h.bf16 %v1414_v19 }
 0x4f6   :  { %v546_v38 = vmul.f32 %v1893_v25, %v537_v31  ;;  %v986_v39 = vsel %vm192_vm2, %v1416_v52, %v1421_v46 }
 0x4f7   :  { %v988_v28 = vsel %vm438_vm4, %v986_v39, %v1426_v43 }
 0x4f8   :  { %v1429_v3 = vpop.permute.xlu1 %1428  ;;  %v1907_v30 = vadd.f32 %v1900_v37, %v546_v38 }
 0x4f9   :  { %v1431_v47 = vunpack.i.h.bf16 %v1429_v3  ;;  %v1430_v48 = vunpack.i.l.bf16 %v1429_v3 }
 0x4fa   :  { %v556_v23 = vpack.c.bf16 %v1907_v30, %v1904_v26 }
 0x4fb   :  { %v989_v4 = vsel %vm441_vm5, %v987_v49, %v1430_v48  ;;  %v990_v50 = vsel %vm441_vm5, %v988_v28, %v1431_v47 }
 0x4fc   :  { %1342 = vmatmul.mubr.msk.bf16.vlgmr.msra.gmra.mxu1 %vm87_vm1, %v556_v23  ;;  %v991_v51 = vpack.c.bf16 %v990_v50, %v989_v4 }
 0x4fd   :  { %1358 = vmatpush3.bf16.msra.mxu1 %v1742_v60  ;;  %1361 = vmatprep.mubr.msk.bf16.mxu1 %vm1557_vm0, %v1556_v0  ;;  %v1439_v60 = vld [vmem:[%s2023_s9 + $0x10] sm:$0xff]  }
 0x4fe   :  { %1359 = vmatprep.subr.bf16.mxu1 %v1556_v0  ;;  %1348 = vmatpush3.bf16.msra.mxu0 %v1439_v60 }
 0x4ff   :  { %1349 = vmatprep.subr.bf16.mxu0 %v1556_v0 }
 0x501   :  { %1360 = vmatpush3.bf16.msra.mxu1 %v1753_v13  ;;  %v1440_v13 = vld [vmem:[%s2023_s9 + $0x8] sm:$0xff]  }
 0x502   :  { %1365 = vmatprep.subr.bf16.mxu1 %v1556_v0  ;;  %1350 = vmatpush3.bf16.msra.mxu0 %v1440_v13 }
 0x503   :  { %1351 = vmatprep.subr.bf16.mxu0 %v1556_v0 }
 0x504   :  { %1362 = vmatmul.mubr.msk.bf16.vlgmr.msra.gmra.mxu1 %vm87_vm1, %v991_v51 }
 0x505   :  { %1366 = vmatpush3.bf16.msra.mxu1 %v1866_v58  ;;  %1369 = vmatprep.mubr.msk.bf16.mxu1 %vm1557_vm0, %v1556_v0 }
 0x506   :  { %1367 = vmatprep.subr.bf16.mxu1 %v1556_v0  ;;  %1352 = vmatpush3.bf16.msra.mxu0 %v1441_v53 }
 0x507   :  { %1373 = vmatprep.subr.bf16.mxu0 %v1556_v0 }
 0x509   :  { %1368 = vmatpush3.bf16.msra.mxu1 %v1873_v63 }
 0x5bc   :  { %v613_v40 = vpop.f32.mrf.mxu1 }
 0x5bd   :  { %v614_v55 = vadd.f32 %v1945_v54, %v613_v40 }
 0x5be   :  { %v1343_v41 = vpop.f32.mrf.mxu1 }
 0x5bf   :  { %v620_v58 = vmax.f32 %v614_v55, 0.0 }
 0x5c0   :  { %v616_v56 = vpop.f32.mrf.mxu1 }
 0x5c1   :  { %v617_v27 = vadd.f32 %v1945_v54, %v616_v56 }
 0x5c2   :  { %v1344_v57 = vpop.f32.mrf.mxu1 }
 0x5c3   :  { %v621_v59 = vmax.f32 %v617_v27, 0.0 }
 0x5c4   :  { %v1036_v61 = vpop.f32.mrf.mxu1 }
 0x5c5   :  { %v622_v62 = vpack.c.bf16 %v621_v59, %v620_v58  ;;  %v1037_v63 = vadd.f32 %v1806_v21, %v1036_v61 }
 0x5c6   :  { %v1363_v1 = vpop.f32.mrf.mxu1 }
 0x5c7   :  { %1354 = vmatmul.mubr.msk.bf16.vlgmr.msra.gmra.mxu0 %vm654_vm7, %v622_v62  ;;  %v1043_v35 = vadd.f32 %v1554_v2, %v1037_v63  ;;  %v1271_v1 = vld [vmem:[%s2028_s11] ss:$0 sm:$0xff] }
 0x5c8   :  { %v1039_v5 = vpop.f32.mrf.mxu1  ;;  %1374 = vmatpush3.bf16.msra.mxu0 %v1884_v15  ;;  %1381 = vmatprep.mubr.msk.bf16.mxu0 %vm1557_vm0, %v1556_v0 }
 0x5c9   :  { %v1040_v6 = vadd.f32 %v1806_v21, %v1039_v5  ;;  %v1045_v7 = vsel %vm87_vm1, %v1043_v35, 0.0  ;;  %1375 = vmatprep.subr.bf16.mxu0 %v1556_v0 }
 0x5ca   :  { %1046 = vadd.xlane.f32.xlu0 %v1045_v7  ;;  %v1364_v8 = vpop.f32.mrf.mxu1 }
 0x5cb   :  { %v1044_v10 = vadd.f32 %v1555_v9, %v1040_v6 }
 0x5cc   :  { %1376 = vmatpush3.bf16.msra.mxu0 %v1439_v60 }
 0x5cd   :  { %v1048_v12 = vsel %vm513_vm6, %v1044_v10, 0.0  ;;  %1377 = vmatprep.subr.bf16.mxu0 %v1556_v0 }
 0x5ce   :  { %1049 = vadd.xlane.f32.xlu1 %v1048_v12 }
 0x5d0   :  { %1378 = vmatpush3.bf16.msra.mxu0 %v1440_v13 }
 0x5d1   :  { %1379 = vmatprep.subr.bf16.mxu0 %v1556_v0 }
 0x5d4   :  { %1380 = vmatpush3.bf16.msra.mxu0 %v1441_v53 }
 0x653   :  { %v1047_v21 = vpop.xlane.xlu0 %1046 }
 0x654   :  { %v1051_v15 = vmul.f32 0.03125, %v1047_v21 }
 0x656   :  { %v1053_v14 = vsub.f32 %v1043_v35, %v1051_v15  ;;  %v1272_v35 = vld [vmem:[%s2029_s12] ss:$0 sm:$0xff] }
 0x657   :  { %v1050_v20 = vpop.xlane.xlu1 %1049 }
 0x658   :  { %v1052_v16 = vmul.f32 0.03125, %v1050_v20  ;;  %v1055_v11 = vmul.f32 %v1053_v14, %v1053_v14 }
 0x65a   :  { %v1054_v17 = vsub.f32 %v1044_v10, %v1052_v16  ;;  %v1057_v18 = vsel %vm87_vm1, %v1055_v11, 0.0 }
 0x65b   :  { %1058 = vadd.xlane.f32.xlu0 %v1057_v18 }
 0x65c   :  { %v1056_v19 = vmul.f32 %v1054_v17, %v1054_v17 }
 0x65e   :  { %v1060_v22 = vsel %vm513_vm6, %v1056_v19, 0.0 }
 0x65f   :  { %1061 = vadd.xlane.f32.xlu0 %v1060_v22 }
 0x687   :  { %v692_v0 = vpop.f32.mrf.mxu0 }
 0x688   :  { %v693_v29 = vadd.f32 %v1971_v24, %v692_v0 }
 0x689   :  { %v1355_v31 = vpop.f32.mrf.mxu0 }
 0x68a   :  { %v699_v32 = vadd.f32 %v693_v29, %v1904_v26 }
 0x68b   :  { %v695_v33 = vpop.f32.mrf.mxu0 }
 0x68c   :  { %v696_v34 = vadd.f32 %v1971_v24, %v695_v33  ;;  %v701_v38 = vsel %vm87_vm1, %v699_v32, 0.0 }
 0x68d   :  { %v1356_v46 = vpop.f32.mrf.mxu0  ;;  %702 = vadd.xlane.f32.xlu1 %v701_v38 }
 0x68e   :  { %v700_v36 = vadd.f32 %v696_v34, %v1907_v30 }
 0x690   :  { %v704_v3 = vsel %vm513_vm6, %v700_v36, 0.0 }
 0x691   :  { %705 = vadd.xlane.f32.xlu0 %v704_v3 }
 0x6e4   :  { %v1059_v52 = vpop.xlane.xlu0 %1058 }
 0x6e5   :  { %v1063_v42 = vmul.f32 0.03125, %v1059_v52 }
 0x6e7   :  { %v1065_v43 = vadd.f32 1e-05, %v1063_v42 }
 0x6e8   :  { %v1062_v44 = vpop.xlane.xlu0 %1061 }
 0x6e9   :  { %1542 = vrsqrt.f32 %v1065_v43  ;;  %v1064_v23 = vmul.f32 0.03125, %v1062_v44 }
 0x6eb   :  { %v1066_v39 = vadd.f32 1e-05, %v1064_v23 }
 0x6ed   :  { %1544 = vrsqrt.f32 %v1066_v39 }
 0x6f6   :  { %v1543_v26 = vpop.eup %1542 }
 0x6f7   :  { %v1069_v45 = vmul.f32 %v1543_v26, %v1053_v14 }
 0x6f9   :  { %v1078_v49 = vmul.f32 %v1893_v25, %v1069_v45 }
 0x6fa   :  { %v1545_v47 = vpop.eup %1544 }
 0x6fb   :  { %v1070_v48 = vmul.f32 %v1545_v47, %v1054_v17  ;;  %v1087_v30 = vadd.f32 %v1900_v37, %v1078_v49 }
 0x6fd   :  { %v1079_v28 = vmul.f32 %v1893_v25, %v1070_v48 }
 0x6ff   :  { %v1088_v4 = vadd.f32 %v1900_v37, %v1079_v28 }
 0x701   :  { %v1089_v50 = vpack.c.bf16 %v1088_v4, %v1087_v30 }
 0x703   :  { %1370 = vmatmul.mubr.msk.bf16.vlgmr.msra.gmra.mxu1 %vm87_vm1, %v1089_v50 }
 0x716   :  { %v703_v51 = vpop.xlane.xlu1 %702 }
 0x717   :  { %v707_v60 = vmul.f32 0.03125, %v703_v51 }
 0x719   :  { %v709_v13 = vsub.f32 %v699_v32, %v707_v60 }
 0x71a   :  { %v706_v53 = vpop.xlane.xlu0 %705 }
 0x71b   :  { %v708_v40 = vmul.f32 0.03125, %v706_v53  ;;  %v711_v41 = vmul.f32 %v709_v13, %v709_v13 }
 0x71d   :  { %v710_v55 = vsub.f32 %v700_v36, %v708_v40  ;;  %v713_v56 = vsel %vm87_vm1, %v711_v41, 0.0 }
 0x71e   :  { %714 = vadd.xlane.f32.xlu1 %v713_v56 }
 0x71f   :  { %v712_v27 = vmul.f32 %v710_v55, %v710_v55 }
 0x721   :  { %v716_v25 = vsel %vm513_vm6, %v712_v27, 0.0 }
 0x722   :  { %717 = vadd.xlane.f32.xlu0 %v716_v25 }
 0x7a7   :  { %v715_v57 = vpop.xlane.xlu1 %714 }
 0x7a8   :  { %v719_v58 = vmul.f32 0.03125, %v715_v57 }
 0x7aa   :  { %v721_v37 = vadd.f32 1e-05, %v719_v58 }
 0x7ab   :  { %v718_v59 = vpop.xlane.xlu0 %717 }
 0x7ac   :  { %1546 = vrsqrt.f32 %v721_v37  ;;  %v720_v61 = vmul.f32 0.03125, %v718_v59 }
 0x7ae   :  { %v722_v62 = vadd.f32 1e-05, %v720_v61 }
 0x7b0   :  { %1548 = vrsqrt.f32 %v722_v62 }
 0x7b9   :  { %v1547_v63 = vpop.eup %1546 }
 0x7ba   :  { %v725_v2 = vmul.f32 %v1547_v63, %v709_v13 }
 0x7bc   :  { %v734_v5 = vmul.f32 %v1271_v1, %v725_v2 }
 0x7bd   :  { %v1549_v6 = vpop.eup %1548 }
 0x7be   :  { %v743_v7 = vadd.f32 %v1272_v35, %v734_v5  ;;  %v726_v8 = vmul.f32 %v1549_v6, %v710_v55 }
 0x7c0   :  { %745 = vst.msk [vmem:[%s2030_s13] sm:$0xff] %vm87_vm1, %v743_v7  ;;  %v735_v9 = vmul.f32 %v1271_v1, %v726_v8 }
 0x7c2   :  { %v744_v10 = vadd.f32 %v1272_v35, %v735_v9 }
 0x7c3   :  { %v1134_v12 = vpop.f32.mrf.mxu1 }
 0x7c4   :  { %746 = vst.msk [vmem:[%s2030_s13 + $0x8] sm:$0x1] %vm513_vm6, %v744_v10  ;;  %v1135_v15 = vadd.f32 %v1945_v54, %v1134_v12 }
 0x7c5   :  { %v1371_v21 = vpop.f32.mrf.mxu1 }
 0x7c6   :  { %v1141_v11 = vmax.f32 %v1135_v15, 0.0 }
 0x7c7   :  { %v1137_v14 = vpop.f32.mrf.mxu1 }
 0x7c8   :  { %v1138_v20 = vadd.f32 %v1945_v54, %v1137_v14 }
 0x7c9   :  { %v1372_v16 = vpop.f32.mrf.mxu1 }
 0x7ca   :  { %v1142_v17 = vmax.f32 %v1138_v20, 0.0 }
 0x7cc   :  { %v1143_v18 = vpack.c.bf16 %v1142_v17, %v1141_v11 }
 0x7ce   :  { %1382 = vmatmul.mubr.msk.bf16.vlgmr.msra.gmra.mxu0 %vm654_vm7, %v1143_v18 }
 0x88e   :  { %v1188_v19 = vpop.f32.mrf.mxu0 }
 0x88f   :  { %v1189_v22 = vadd.f32 %v1971_v24, %v1188_v19 }
 0x890   :  { %v1383_v0 = vpop.f32.mrf.mxu0 }
 0x891   :  { %v1195_v29 = vadd.f32 %v1189_v22, %v1087_v30 }
 0x892   :  { %v1191_v31 = vpop.f32.mrf.mxu0 }
 0x893   :  { %v1192_v32 = vadd.f32 %v1971_v24, %v1191_v31  ;;  %v1197_v33 = vsel %vm87_vm1, %v1195_v29, 0.0 }
 0x894   :  { %1198 = vadd.xlane.f32.xlu1 %v1197_v33  ;;  %v1384_v34 = vpop.f32.mrf.mxu0 }
 0x895   :  { %v1196_v38 = vadd.f32 %v1192_v32, %v1088_v4 }
 0x897   :  { %v1200_v54 = vsel %vm513_vm6, %v1196_v38, 0.0 }
 0x898   :  { %1201 = vadd.xlane.f32.xlu0 %v1200_v54 }
 0x91d   :  { %v1199_v46 = vpop.xlane.xlu1 %1198 }
 0x91e   :  { %v1203_v36 = vmul.f32 0.03125, %v1199_v46 }
 0x920   :  { %v1205_v3 = vsub.f32 %v1195_v29, %v1203_v36 }
 0x921   :  { %v1202_v52 = vpop.xlane.xlu0 %1201 }
 0x922   :  { %v1204_v42 = vmul.f32 0.03125, %v1202_v52  ;;  %v1207_v43 = vmul.f32 %v1205_v3, %v1205_v3 }
 0x924   :  { %v1206_v44 = vsub.f32 %v1196_v38, %v1204_v42  ;;  %v1209_v23 = vsel %vm87_vm1, %v1207_v43, 0.0 }
 0x925   :  { %1210 = vadd.xlane.f32.xlu1 %v1209_v23 }
 0x926   :  { %v1208_v39 = vmul.f32 %v1206_v44, %v1206_v44 }
 0x928   :  { %v1212_v24 = vsel %vm513_vm6, %v1208_v39, 0.0 }
 0x929   :  { %1213 = vadd.xlane.f32.xlu0 %v1212_v24 }
 0x9ae   :  { %v1211_v26 = vpop.xlane.xlu1 %1210 }
 0x9af   :  { %v1215_v45 = vmul.f32 0.03125, %v1211_v26 }
 0x9b1   :  { %v1217_v47 = vadd.f32 1e-05, %v1215_v45 }
 0x9b2   :  { %v1214_v48 = vpop.xlane.xlu0 %1213 }
 0x9b3   :  { %1550 = vrsqrt.f32 %v1217_v47  ;;  %v1216_v49 = vmul.f32 0.03125, %v1214_v48 }
 0x9b5   :  { %v1218_v28 = vadd.f32 1e-05, %v1216_v49 }
 0x9b7   :  { %1552 = vrsqrt.f32 %v1218_v28 }
 0x9c0   :  { %v1551_v30 = vpop.eup %1550 }
 0x9c1   :  { %v1221_v4 = vmul.f32 %v1551_v30, %v1205_v3 }
 0x9c3   :  { %v1230_v50 = vmul.f32 %v1271_v1, %v1221_v4 }
 0x9c4   :  { %v1553_v51 = vpop.eup %1552 }
 0x9c5   :  { %v1239_v60 = vadd.f32 %v1272_v35, %v1230_v50  ;;  %v1222_v13 = vmul.f32 %v1553_v51, %v1206_v44 }
 0x9c7   :  { %1283 = vst.msk [vmem:[%s2030_s13 + $0x10] sm:$0xff] %vm87_vm1, %v1239_v60  ;;  %v1231_v53 = vmul.f32 %v1271_v1, %v1222_v13 }
 0x9c9   :  { %v1240_v40 = vadd.f32 %v1272_v35, %v1231_v53 }
 0x9cb   :  { %1284 = vst.msk [vmem:[%s2030_s13 + $0x18] sm:$0x1] %vm513_vm6, %v1240_v40 }

</bundles_post_ra>
